<compile_context>
chip_gen: v5e
topology: v5e:2x2
jax: 0.10.0
libtpu: 0.0.40
codegen_flags: <defaults>
</compile_context>

<pallas_src>
import math
from functools import partial

import jax
import jax.numpy as jnp
from jax.experimental import pallas as pl
from jax.experimental.pallas import tpu as pltpu


def _round_up(v: int, m: int) -> int:
    return (v + m - 1) // m * m


def _fused_mlp_kernel(x_ref, w1_ref, b1_ref, w2_ref, b2_ref, w3_ref, b3_ref, o_ref):
    # One batch tile flows through all three layers; intermediates stay in
    # VMEM/vregs (never written back to HBM).
    x = x_ref[...].astype(jnp.bfloat16)

    h1 = jnp.dot(x, w1_ref[...], preferred_element_type=jnp.float32) + b1_ref[...]
    h1 = jnp.maximum(h1, 0.0)

    h2 = jnp.dot(h1.astype(jnp.bfloat16), w2_ref[...],
                 preferred_element_type=jnp.float32) + b2_ref[...]
    h2 = jnp.maximum(h2, 0.0)

    y = jnp.dot(h2.astype(jnp.bfloat16), w3_ref[...],
                preferred_element_type=jnp.float32) + b3_ref[...]
    o_ref[...] = y.astype(o_ref.dtype)


@partial(jax.jit, static_argnames=("tm",))
def _fused_mlp_call(x_pad, w1, b1, w2, b2, w3, b3, *, tm):
    B_pad, IN = x_pad.shape
    H1P = w1.shape[1]
    H2P = w2.shape[1]
    OUTP = w3.shape[1]

    flops = 2 * B_pad * (IN * H1P + H1P * H2P + H2P * OUTP)
    bytes_accessed = (
        B_pad * IN * 4                                   # x (f32)
        + (IN * H1P + H1P * H2P + H2P * OUTP) * 2        # weights (bf16)
        + (H1P + H2P + OUTP) * 4                         # biases (f32)
        + B_pad * OUTP * 4                               # logits out (f32)
    )

    grid_spec = pl.GridSpec(
        grid=(B_pad // tm,),
        in_specs=[
            pl.BlockSpec((tm, IN), lambda i: (i, 0)),     # x tile (moves per step)
            pl.BlockSpec((IN, H1P), lambda i: (0, 0)),    # weights: VMEM-resident
            pl.BlockSpec((1, H1P), lambda i: (0, 0)),
            pl.BlockSpec((H1P, H2P), lambda i: (0, 0)),
            pl.BlockSpec((1, H2P), lambda i: (0, 0)),
            pl.BlockSpec((H2P, OUTP), lambda i: (0, 0)),
            pl.BlockSpec((1, OUTP), lambda i: (0, 0)),
        ],
        out_specs=pl.BlockSpec((tm, OUTP), lambda i: (i, 0)),
    )

    return pl.pallas_call(
        _fused_mlp_kernel,
        out_shape=jax.ShapeDtypeStruct((B_pad, OUTP), jnp.float32),
        grid_spec=grid_spec,
        compiler_params=pltpu.CompilerParams(
            dimension_semantics=("parallel",),
            vmem_limit_bytes=64 << 20,
        ),
        cost_estimate=pl.CostEstimate(
            flops=flops, transcendentals=0, bytes_accessed=bytes_accessed
        ),
    )(x_pad, w1, b1, w2, b2, w3, b3)


def fused_mlp(x, w1, b1, w2, b2, w3, b3):
    """Fused 3-layer MLP forward. Returns (B, OUT_padded) float32 logits."""
    B, IN = x.shape
    assert w1.shape[0] == IN and w2.shape[0] == w1.shape[1] and w3.shape[0] == w2.shape[1]

    # Batch tiling: small batches -> single tile (rounded to sublane multiple
    # of 8); large batches -> 256-row tiles to fill the MXU and pipeline the
    # per-tile x load / logits store behind compute.
    if B <= 256:
        TM = _round_up(max(B, 1), 8)
        B_pad = TM
    else:
        TM = 256
        B_pad = _round_up(B, TM)
    if B_pad != B:
        x = jnp.pad(x, ((0, B_pad - B), (0, 0)))

    out = _fused_mlp_call(x, w1, b1, w2, b2, w3, b3, tm=TM)
    return out[:B]


class SelfMadeNetworkPallas:
    """JAX/Pallas port of the PyTorch SelfMadeNetwork forward (eval mode)."""

    HIDDEN1 = 600
    HIDDEN2 = 400

    def __init__(self, in_features: int, out_features: int, key):
        self.in_features = in_features
        self.out_features = out_features

        h1p = _round_up(self.HIDDEN1, 128)   # 640
        h2p = _round_up(self.HIDDEN2, 128)   # 512
        outp = _round_up(out_features, 128)  # 128 for out_features=10

        k1, k2, k3, k4, k5, k6 = jax.random.split(key, 6)

        def init_linear(kw, kb, fan_in, fan_out, fan_in_pad, fan_out_pad):
            # PyTorch nn.Linear default init: U(-1/sqrt(fan_in), 1/sqrt(fan_in)),
            # stored transposed as (in, out); zero-pad to lane-aligned shapes.
            bound = 1.0 / math.sqrt(fan_in)
            w = jax.random.uniform(kw, (fan_in, fan_out), jnp.float32, -bound, bound)
            b = jax.random.uniform(kb, (fan_out,), jnp.float32, -bound, bound)
            w = jnp.pad(w, ((0, fan_in_pad - fan_in), (0, fan_out_pad - fan_out)))
            b = jnp.pad(b, (0, fan_out_pad - fan_out))
            return w.astype(jnp.bfloat16), b.reshape(1, fan_out_pad).astype(jnp.float32)

        self.w1, self.b1 = init_linear(k1, k2, in_features, self.HIDDEN1,
                                       in_features, h1p)
        self.w2, self.b2 = init_linear(k3, k4, self.HIDDEN1, self.HIDDEN2, h1p, h2p)
        self.w3, self.b3 = init_linear(k5, k6, self.HIDDEN2, out_features, h2p, outp)

    def __call__(self, x):
        out = fused_mlp(x, self.w1, self.b1, self.w2, self.b2, self.w3, self.b3)
        return out[:, : self.out_features]


if __name__ == "__main__":
    key = jax.random.PRNGKey(0)
    k_param, k_x = jax.random.split(key)

    batch = 8
    in_features = 64
    out_features = 10

    net = SelfMadeNetworkPallas(in_features, out_features, k_param)
    x = jax.random.normal(k_x, (batch, in_features), dtype=jnp.float32)

    out = jax.block_until_ready(net(x))

    # Plain-JAX reference mirroring the kernel math (bf16 operands, f32
    # accumulate, same zero-padded weights) so the comparison is exact-ish.
    def ref_forward(xv):
        h = jnp.dot(xv.astype(jnp.bfloat16), net.w1,
                    preferred_element_type=jnp.float32) + net.b1
        h = jnp.maximum(h, 0.0)
        h = jnp.dot(h.astype(jnp.bfloat16), net.w2,
                    preferred_element_type=jnp.float32) + net.b2
        h = jnp.maximum(h, 0.0)
        y = jnp.dot(h.astype(jnp.bfloat16), net.w3,
                    preferred_element_type=jnp.float32) + net.b3
        return y[:, :out_features]

    ref = ref_forward(x)
    assert out.shape == (batch, out_features)
    assert jnp.allclose(out, ref, atol=2e-3, rtol=2e-2), float(
        jnp.max(jnp.abs(out - ref))
    )

    print("KERNEL_OK")
</pallas_src>

<mosaic_0001>
module attributes {stable_mosaic.version = 11 : i64} {
  func.func @_fused_mlp_kernel(%arg0: i32, %arg1: memref<8x64xf32, #tpu.memory_space<vmem>>, %arg2: memref<64x640xbf16, #tpu.memory_space<vmem>>, %arg3: memref<1x640xf32, #tpu.memory_space<vmem>>, %arg4: memref<640x512xbf16, #tpu.memory_space<vmem>>, %arg5: memref<1x512xf32, #tpu.memory_space<vmem>>, %arg6: memref<512x128xbf16, #tpu.memory_space<vmem>>, %arg7: memref<1x128xf32, #tpu.memory_space<vmem>>, %arg8: memref<8x128xf32, #tpu.memory_space<vmem>>) attributes {dimension_semantics = [#tpu.dimension_semantics<parallel>], iteration_bounds = array<i64: 1>, scalar_prefetch = 0 : i64, scratch_operands = 0 : i64, tpu.core_type = #tpu.core_type<tc>, window_params = [{transform_indices = @transform_0, window_bounds = array<i64: 8, 64>}, {pipeline_mode = #tpu.pipeline_mode<synchronous>, transform_indices = @transform_1, window_bounds = array<i64: 64, 640>}, {pipeline_mode = #tpu.pipeline_mode<synchronous>, transform_indices = @transform_2, window_bounds = array<i64: 1, 640>}, {pipeline_mode = #tpu.pipeline_mode<synchronous>, transform_indices = @transform_3, window_bounds = array<i64: 640, 512>}, {pipeline_mode = #tpu.pipeline_mode<synchronous>, transform_indices = @transform_4, window_bounds = array<i64: 1, 512>}, {pipeline_mode = #tpu.pipeline_mode<synchronous>, transform_indices = @transform_5, window_bounds = array<i64: 512, 128>}, {pipeline_mode = #tpu.pipeline_mode<synchronous>, transform_indices = @transform_6, window_bounds = array<i64: 1, 128>}, {transform_indices = @transform_7, window_bounds = array<i64: 8, 128>}]} {
    %c0 = arith.constant 0 : index
    %c0_0 = arith.constant 0 : index
    %0 = vector.load %arg1[%c0, %c0_0] : memref<8x64xf32, #tpu.memory_space<vmem>>, vector<8x64xf32>
    %1 = arith.truncf %0 : vector<8x64xf32> to vector<8x64xbf16>
    %c0_1 = arith.constant 0 : index
    %c0_2 = arith.constant 0 : index
    %2 = vector.load %arg2[%c0_1, %c0_2] : memref<64x640xbf16, #tpu.memory_space<vmem>>, vector<64x640xbf16>
    %cst = arith.constant dense<0.000000e+00> : vector<8x640xf32>
    %3 = tpu.matmul %1, %2, %cst {dimension_numbers = #tpu.dot_dimension_numbers<[1], [0], [0], [1], [0, 0, 1, 1], [], []>} : vector<8x64xbf16>, vector<64x640xbf16>, vector<8x640xf32> -> vector<8x640xf32>
    %c0_3 = arith.constant 0 : index
    %c0_4 = arith.constant 0 : index
    %4 = vector.load %arg3[%c0_3, %c0_4] : memref<1x640xf32, #tpu.memory_space<vmem>>, vector<1x640xf32>
    %5 = vector.broadcast %4 : vector<1x640xf32> to vector<8x640xf32>
    %6 = arith.addf %3, %5 : vector<8x640xf32>
    %cst_5 = arith.constant 0.000000e+00 : f32
    %7 = vector.broadcast %cst_5 : f32 to vector<8x640xf32>
    %8 = arith.maximumf %6, %7 : vector<8x640xf32>
    %9 = arith.truncf %8 : vector<8x640xf32> to vector<8x640xbf16>
    %c0_6 = arith.constant 0 : index
    %c0_7 = arith.constant 0 : index
    %10 = vector.load %arg4[%c0_6, %c0_7] : memref<640x512xbf16, #tpu.memory_space<vmem>>, vector<640x512xbf16>
    %cst_8 = arith.constant dense<0.000000e+00> : vector<8x512xf32>
    %11 = tpu.matmul %9, %10, %cst_8 {dimension_numbers = #tpu.dot_dimension_numbers<[1], [0], [0], [1], [0, 0, 1, 1], [], []>} : vector<8x640xbf16>, vector<640x512xbf16>, vector<8x512xf32> -> vector<8x512xf32>
    %c0_9 = arith.constant 0 : index
    %c0_10 = arith.constant 0 : index
    %12 = vector.load %arg5[%c0_9, %c0_10] : memref<1x512xf32, #tpu.memory_space<vmem>>, vector<1x512xf32>
    %13 = vector.broadcast %12 : vector<1x512xf32> to vector<8x512xf32>
    %14 = arith.addf %11, %13 : vector<8x512xf32>
    %cst_11 = arith.constant 0.000000e+00 : f32
    %15 = vector.broadcast %cst_11 : f32 to vector<8x512xf32>
    %16 = arith.maximumf %14, %15 : vector<8x512xf32>
    %17 = arith.truncf %16 : vector<8x512xf32> to vector<8x512xbf16>
    %c0_12 = arith.constant 0 : index
    %c0_13 = arith.constant 0 : index
    %18 = vector.load %arg6[%c0_12, %c0_13] : memref<512x128xbf16, #tpu.memory_space<vmem>>, vector<512x128xbf16>
    %cst_14 = arith.constant dense<0.000000e+00> : vector<8x128xf32>
    %19 = tpu.matmul %17, %18, %cst_14 {dimension_numbers = #tpu.dot_dimension_numbers<[1], [0], [0], [1], [0, 0, 1, 1], [], []>} : vector<8x512xbf16>, vector<512x128xbf16>, vector<8x128xf32> -> vector<8x128xf32>
    %c0_15 = arith.constant 0 : index
    %c0_16 = arith.constant 0 : index
    %20 = vector.load %arg7[%c0_15, %c0_16] : memref<1x128xf32, #tpu.memory_space<vmem>>, vector<1x128xf32>
    %21 = vector.broadcast %20 : vector<1x128xf32> to vector<8x128xf32>
    %22 = arith.addf %19, %21 : vector<8x128xf32>
    %c0_17 = arith.constant 0 : index
    %c0_18 = arith.constant 0 : index
    %23 = vector.load %arg8[%c0_17, %c0_18] : memref<8x128xf32, #tpu.memory_space<vmem>>, vector<8x128xf32>
    tpu.vector_store %arg8[%c0_17, %c0_18], %22 {strides = array<i32>} : memref<8x128xf32, #tpu.memory_space<vmem>>, vector<8x128xf32>,
    return
  }
  func.func @transform_0(%arg0: i32) -> (i32, i32) {
    %c0_i32 = arith.constant 0 : i32
    %c0_i32_0 = arith.constant 0 : i32
    return %arg0, %c0_i32 : i32, i32
  }
  func.func @transform_1(%arg0: i32) -> (i32, i32) {
    %c0_i32 = arith.constant 0 : i32
    %c0_i32_0 = arith.constant 0 : i32
    %c0_i32_1 = arith.constant 0 : i32
    return %c0_i32, %c0_i32_0 : i32, i32
  }
  func.func @transform_2(%arg0: i32) -> (i32, i32) {
    %c0_i32 = arith.constant 0 : i32
    %c0_i32_0 = arith.constant 0 : i32
    %c0_i32_1 = arith.constant 0 : i32
    return %c0_i32, %c0_i32_0 : i32, i32
  }
  func.func @transform_3(%arg0: i32) -> (i32, i32) {
    %c0_i32 = arith.constant 0 : i32
    %c0_i32_0 = arith.constant 0 : i32
    %c0_i32_1 = arith.constant 0 : i32
    return %c0_i32, %c0_i32_0 : i32, i32
  }
  func.func @transform_4(%arg0: i32) -> (i32, i32) {
    %c0_i32 = arith.constant 0 : i32
    %c0_i32_0 = arith.constant 0 : i32
    %c0_i32_1 = arith.constant 0 : i32
    return %c0_i32, %c0_i32_0 : i32, i32
  }
  func.func @transform_5(%arg0: i32) -> (i32, i32) {
    %c0_i32 = arith.constant 0 : i32
    %c0_i32_0 = arith.constant 0 : i32
    %c0_i32_1 = arith.constant 0 : i32
    return %c0_i32, %c0_i32_0 : i32, i32
  }
  func.func @transform_6(%arg0: i32) -> (i32, i32) {
    %c0_i32 = arith.constant 0 : i32
    %c0_i32_0 = arith.constant 0 : i32
    %c0_i32_1 = arith.constant 0 : i32
    return %c0_i32, %c0_i32_0 : i32, i32
  }
  func.func @transform_7(%arg0: i32) -> (i32, i32) {
    %c0_i32 = arith.constant 0 : i32
    %c0_i32_0 = arith.constant 0 : i32
    return %arg0, %c0_i32 : i32, i32
  }
}

</mosaic_0001>

<bundles_post_ra>
// kernel: _fused_mlp_call.1
= control target key start
LH: loop header
LB: loop body
LE: loop exit
PB: predicated region body
PF: predicated region fallthrough
CT: control target
= control target key end

     0   :  { %12 = vsyncpa [#allocation3], 0  ;;  %s3297_s0 = inlined_call_operand.hbm [shape: f32[8,64], index: 0, kind: input, shape index: {}]   ;;  %s3298_s1 = inlined_call_operand.hbm [shape: bf16[64,640], index: 1, kind: input, shape index: {}]   ;;  %s3299_s2 = inlined_call_operand.hbm [shape: f32[1,640], index: 2, kind: input, shape index: {}]   ;;  %s3300_s3 = inlined_call_operand.hbm [shape: bf16[640,512], index: 3, kind: input, shape index: {}]   ;;  %s3301_s4 = inlined_call_operand.hbm [shape: f32[1,512], index: 4, kind: input, shape index: {}]   ;;  %s3302_s5 = inlined_call_operand.hbm [shape: bf16[512,128], index: 5, kind: input, shape index: {}]   ;;  %s3303_s6 = inlined_call_operand.vmem [shape: f32[1,128], index: 6, kind: input, shape index: {}]   ;;  %s3304_s7 = inlined_call_operand.hbm [shape: f32[8,128], index: 7, kind: output, shape index: {}]  }
   0x1   :  { %13 = vsyncpa [#allocation6], 0 }
   0x2   :  { %14 = vsyncpa [#allocation9], 0 }
   0x3   :  { %15 = vsyncpa [#allocation12], 0  ;;  %s32_s26 = sshll.u32 %s3298_s1, 4  ;;  %s33_s26 = int_to_ptr.hbm [resolvable:$true] %s32_s26 }
   0x4   :  { %16 = vsyncpa [#allocation4], 0  ;;  %s3165_s27 = smov [#allocation5]   ;;  %s56_s8 = sshll.u32 %s3300_s3, 4  ;;  %s57_s8 = int_to_ptr.hbm [resolvable:$true] %s56_s8 }
   0x5   :  { %s34_s28 = sshll.u32 %s3165_s27, 4  ;;  %s3166_s9 = smov 320   ;;  %s35_s28 = int_to_ptr.vmem [resolvable:$true] %s34_s28 }
   0x6   :  { %s3167_s10 = smov 20   ;;  %s3168_s11 = smov [#allocation8]  }
   0x7   :  { %40 = dma.hbm_to_vmem [thread:$0]  %s33_s26, 2560, %s35_s28, [#allocation6], %s3166_s9, %s3166_s9, %s3167_s10  }
   0x8   :  { %s58_s12 = sshll.u32 %s3168_s11, 4  ;;  %s3169_s13 = smov 256   ;;  %s59_s12 = int_to_ptr.vmem [resolvable:$true] %s58_s12 }
   0x9   :  { %s3170_s14 = smov 16   ;;  %s22_s16 = sshll.u32 %s3297_s0, 4  ;;  %s23_s16 = int_to_ptr.hbm [resolvable:$true] %s22_s16 }
   0xa   :  { %64 = dma.hbm_to_vmem [thread:$0]  %s57_s8, 20480, %s59_s12, [#allocation9], %s3169_s13, %s3169_s13, %s3170_s14  }
   0xb   :  { %s3171_s17 = smov [#allocation2]   ;;  %s46_s20 = sshll.u32 %s3299_s2, 4  ;;  %s47_s20 = int_to_ptr.hbm [resolvable:$true] %s46_s20 }
   0xc   :  { %s24_s18 = sshll.u32 %s3171_s17, 4  ;;  %s3172_s21 = smov [#allocation7]   ;;  %s25_s18 = int_to_ptr.vmem [resolvable:$true] %s24_s18 }
   0xd   :  { %27 = dma.hbm_to_vmem [thread:$0]  %s23_s16, 128, %s25_s18, [#allocation3]  }
   0xe   :  { %s48_s22 = sshll.u32 %s3172_s21, 4  ;;  %s70_s25 = sshll.u32 %s3301_s4, 4  ;;  %s49_s22 = int_to_ptr.vmem [resolvable:$true] %s48_s22  ;;  %s71_s25 = int_to_ptr.hbm [resolvable:$true] %s70_s25 }
   0xf   :  { %51 = dma.hbm_to_vmem [thread:$0]  %s47_s20, 80, %s49_s22, [#allocation6]  }
  0x10   :  { %s80_s27 = sshll.u32 %s3302_s5, 4  ;;  %s3173_s28 = smov [#allocation10]   ;;  %s81_s27 = int_to_ptr.hbm [resolvable:$true] %s80_s27 }
  0x11   :  { %s72_s29 = sshll.u32 %s3173_s28, 4  ;;  %s3174_s2 = smov [#allocation11]   ;;  %s73_s29 = int_to_ptr.vmem [resolvable:$true] %s72_s29 }
  0x12   :  { %75 = dma.hbm_to_vmem [thread:$0]  %s71_s25, 64, %s73_s29, [#allocation9]  }
  0x13   :  { %s82_s30 = sshll.u32 %s3174_s2, 4  ;;  %s3175_s8 = smov 64   ;;  %s83_s30 = int_to_ptr.vmem [resolvable:$true] %s82_s30 }
  0x14   :  { %s3176_s9 = smov 4  }
  0x15   :  { %88 = dma.hbm_to_vmem [thread:$0]  %s81_s27, 4096, %s83_s30, [#allocation12], %s3175_s8, %s3175_s8, %s3176_s9  }
  0x16   :  { %3155 = dma.done.wait [#allocation3], 128  }
  0x17   :  { %3156 = vsyncadd [#allocation3], 4294967168 }
  0x18   :  { %3157 = dma.done.wait [#allocation6], 2640  }
  0x19   :  { %3158 = vsyncadd [#allocation6], 4294964656 }
  0x1a   :  { %3159 = dma.done.wait [#allocation9], 20544  }
  0x1b   :  { %3160 = vsyncadd [#allocation9], 4294946752 }
  0x1c   :  { %3161 = dma.done.wait [#allocation12], 4096  }
  0x1d   :  { %3162 = vsyncadd [#allocation12], 4294963200  ;;  %v1970_v0 = vld [vmem:[#allocation5 + $0x78] sm:$0xf]  ;;  %v2778_v1 = vld [vmem:[#allocation5 + $0x88] sm:$0xf0] }
  0x1e   :  { %v2776_v2 = vld [vmem:[#allocation5 + $0x7c] sm:$0xf]  ;;  %v1971_v3 = vor.u32 %v2778_v1, %v1970_v0  ;;  %v1972_v4 = vld [vmem:[#allocation5 + $0x8c] sm:$0xf0]  ;;  %v1978_v5 = vld [vmem:[#allocation5 + $0x80] sm:$0xf] }
  0x1f   :  { %v2779_v6 = vld [vmem:[#allocation5 + $0x90] sm:$0xf0]  ;;  %v1975_v7 = vor.u32 %v2776_v2, %v1972_v4  ;;  %v2777_v9 = vld [vmem:[#allocation5 + $0x84] sm:$0xf]  ;;  %v1980_v10 = vld [vmem:[#allocation5 + $0x94] sm:$0xf0] }
  0x20   :  { %v1979_v8 = vor.u32 %v2779_v6, %v1978_v5  ;;  %v1950_v11 = vld [vmem:[#allocation5 + $0x50] sm:$0xf]  ;;  %266 = vmatpush.bf16.msra.mxu0 %v1971_v3  ;;  %v1983_v12 = vor.u32 %v2777_v9, %v1980_v10  ;;  %v2773_v13 = vld [vmem:[#allocation5 + $0x60] sm:$0xf0]  ;;  %v2771_v14 = vld [vmem:[#allocation5 + $0x54] sm:$0xf] }
  0x21   :  { %v1952_v15 = vld [vmem:[#allocation5 + $0x64] sm:$0xf0]  ;;  %279 = vmatpush.bf16.msra.mxu1 %v1975_v7  ;;  %v1951_v16 = vor.u32 %v2773_v13, %v1950_v11  ;;  %v1958_v18 = vld [vmem:[#allocation5 + $0x58] sm:$0xf]  ;;  %v2774_v19 = vld [vmem:[#allocation5 + $0x68] sm:$0xf0] }
  0x22   :  { %292 = vmatpush.bf16.msra.mxu2 %v1979_v8  ;;  %v1955_v17 = vor.u32 %v2771_v14, %v1952_v15  ;;  %v2772_v20 = vld [vmem:[#allocation5 + $0x5c] sm:$0xf]  ;;  %305 = vmatpush.bf16.msra.mxu3 %v1983_v12  ;;  %v1959_v21 = vor.u32 %v2774_v19, %v1958_v18  ;;  %v1960_v22 = vld [vmem:[#allocation5 + $0x6c] sm:$0xf0]  ;;  %v1930_v23 = vld [vmem:[#allocation5 + $0x28] sm:$0xf] }
  0x23   :  { %v2768_v24 = vld [vmem:[#allocation5 + $0x38] sm:$0xf0]  ;;  %v1963_v25 = vor.u32 %v2772_v20, %v1960_v22  ;;  %v2766_v26 = vld [vmem:[#allocation5 + $0x2c] sm:$0xf]  ;;  %v1932_v27 = vld [vmem:[#allocation5 + $0x3c] sm:$0xf0] }
  0x24   :  { %v1938_v28 = vld [vmem:[#allocation5 + $0x30] sm:$0xf]  ;;  %267 = vmatpush.bf16.msra.mxu0 %v1951_v16  ;;  %v1931_v29 = vor.u32 %v2768_v24, %v1930_v23  ;;  %v2769_v30 = vld [vmem:[#allocation5 + $0x40] sm:$0xf0]  ;;  %v2767_v31 = vld [vmem:[#allocation5 + $0x34] sm:$0xf]  ;;  %v1935_v33 = vor.u32 %v2766_v26, %v1932_v27 }
  0x25   :  { %v1940_v32 = vld [vmem:[#allocation5 + $0x44] sm:$0xf0]  ;;  %280 = vmatpush.bf16.msra.mxu1 %v1955_v17  ;;  %v1939_v34 = vor.u32 %v2769_v30, %v1938_v28  ;;  %v1910_v35 = vld [vmem:[#allocation5] sm:$0xf]  ;;  %v2763_v36 = vld [vmem:[#allocation5 + $0x10] sm:$0xf0] }
  0x26   :  { %293 = vmatpush.bf16.msra.mxu2 %v1959_v21  ;;  %v2761_v37 = vld [vmem:[#allocation5 + $0x4] sm:$0xf]  ;;  %306 = vmatpush.bf16.msra.mxu3 %v1963_v25  ;;  %v1943_v38 = vor.u32 %v2767_v31, %v1940_v32  ;;  %v1912_v39 = vld [vmem:[#allocation5 + $0x14] sm:$0xf0]  ;;  %v1918_v40 = vld [vmem:[#allocation5 + $0x8] sm:$0xf]  ;;  %v1911_v44 = vor.u32 %v2763_v36, %v1910_v35 }
  0x27   :  { %v2764_v41 = vld [vmem:[#allocation5 + $0x18] sm:$0xf0]  ;;  %v2762_v42 = vld [vmem:[#allocation5 + $0xc] sm:$0xf]  ;;  %v1920_v43 = vld [vmem:[#allocation5 + $0x1c] sm:$0xf0]  ;;  %v1915_v48 = vor.u32 %v2761_v37, %v1912_v39 }
  0x28   :  { %268 = vmatpush.bf16.msra.mxu0 %v1931_v29  ;;  %v116_v45 = vld [vmem:[#allocation2] sm:$0xff]  ;;  %v1986_v46 = vld [vmem:[#allocation5 + $0x88] sm:$0xf]  ;;  %v1919_v49 = vor.u32 %v2764_v41, %v1918_v40  ;;  %v1923_v50 = vor.u32 %v2762_v42, %v1920_v43  ;;  %v1966_v52 = vld [vmem:[#allocation5 + $0x60] sm:$0xf]  ;;  %vm258_vm0 = vcmask 523264  }
  0x29   :  { %v2780_v47 = vld [vmem:[#allocation5 + $0x98] sm:$0xf0]  ;;  %281 = vmatpush.bf16.msra.mxu1 %v1935_v33  ;;  %v2775_v53 = vld [vmem:[#allocation5 + $0x70] sm:$0xf0]  ;;  %v2107_v54 = vld [vmem:[#allocation8 + $0xe0] sm:$0xf]  ;;  %v3236_v55 = vpack.c.bf16 %v116_v45, %v116_v45 }
  0x2a   :  { %294 = vmatpush.bf16.msra.mxu2 %v1939_v34  ;;  %307 = vmatpush.bf16.msra.mxu3 %v1943_v38  ;;  %v1987_v51 = vor.u32 %v2780_v47, %v1986_v46  ;;  %v2811_v56 = vld [vmem:[#allocation8 + $0xec] sm:$0xf0]  ;;  %v2235_v57 = vld [vmem:[#allocation8 + $0x1e0] sm:$0xf]  ;;  %v1967_v1 = vor.u32 %v2775_v53, %v1966_v52  ;;  %v2770_v6 = vld [vmem:[#allocation5 + $0x48] sm:$0xf0] }
  0x2b   :  { %v2843_v58 = vld [vmem:[#allocation8 + $0x1ec] sm:$0xf0]  ;;  %v2108_v59 = vor.u32 %v2811_v56, %v2107_v54  ;;  %v2091_v60 = vld [vmem:[#allocation8 + $0xc0] sm:$0xf]  ;;  %v1926_v12 = vld [vmem:[#allocation5 + $0x10] sm:$0xf] }
  0x2c   :  { %269 = vmatpush.bf16.msra.mxu0 %v1911_v44  ;;  %v2807_v61 = vld [vmem:[#allocation8 + $0xcc] sm:$0xf0]  ;;  %v2236_v62 = vor.u32 %v2843_v58, %v2235_v57  ;;  %v2363_v63 = vld [vmem:[#allocation8 + $0x2e0] sm:$0xf]  ;;  %s3177_s10 = smov [#allocation13]   ;;  %s1895_s14 = sshll.u32 %s3304_s7, 4  ;;  %s1896_s14 = int_to_ptr.hbm [resolvable:$true] %s1895_s14 }
  0x2d   :  { %282 = vmatpush.bf16.msra.mxu1 %v1915_v48  ;;  %v2875_v0 = vld [vmem:[#allocation8 + $0x2ec] sm:$0xf0]  ;;  %v2219_v2 = vld [vmem:[#allocation8 + $0x1c0] sm:$0xf]  ;;  %v2092_v7 = vor.u32 %v2807_v61, %v2091_v60  ;;  %s1893_s11 = sshll.u32 %s3177_s10, 4  ;;  %s1894_s11 = int_to_ptr.vmem [resolvable:$true] %s1893_s11 }
  0x2e   :  { %295 = vmatpush.bf16.msra.mxu2 %v1919_v49  ;;  %308 = vmatpush.bf16.msra.mxu3 %v1923_v50  ;;  %v2839_v3 = vld [vmem:[#allocation8 + $0x1cc] sm:$0xf0]  ;;  %v2364_v4 = vor.u32 %v2875_v0, %v2363_v63  ;;  %v2075_v8 = vld [vmem:[#allocation8 + $0xa0] sm:$0xf] }
  0x2f   :  { %1988 = vmatmul.msk.bf16.vlgmr.msra.gmra.mxu0 %vm258_vm0, %v3236_v55  ;;  %v1946_v5 = vld [vmem:[#allocation5 + $0x38] sm:$0xf]  ;;  %v2347_v10 = vld [vmem:[#allocation8 + $0x2c0] sm:$0xf]  ;;  %v2220_v13 = vor.u32 %v2839_v3, %v2219_v2 }
  0x30   :  { %318 = vmatpush.bf16.msrb.mxu0 %v1987_v51  ;;  %1989 = vmatmul.msk.bf16.vlgmr.msra.gmra.mxu1 %vm258_vm0, %v3236_v55  ;;  %v2803_v9 = vld [vmem:[#allocation8 + $0xac] sm:$0xf0]  ;;  %v1947_v14 = vor.u32 %v2770_v6, %v1946_v5  ;;  %v2765_v15 = vld [vmem:[#allocation5 + $0x20] sm:$0xf0] }
  0x31   :  { %1307 = vmatpush.bf16.msrb.mxu1 %v2108_v59  ;;  %1990 = vmatmul.msk.bf16.vlgmr.msra.gmra.mxu2 %vm258_vm0, %v3236_v55  ;;  %v2871_v11 = vld [vmem:[#allocation8 + $0x2cc] sm:$0xf0]  ;;  %v2203_v16 = vld [vmem:[#allocation8 + $0x1a0] sm:$0xf]  ;;  %v2076_v20 = vor.u32 %v2803_v9, %v2075_v8  ;;  %v1927_v27 = vor.u32 %v2765_v15, %v1926_v12 }
  0x32   :  { %1991 = vmatmul.msk.bf16.vlgmr.msra.gmra.mxu3 %vm258_vm0, %v3236_v55  ;;  %1320 = vmatpush.bf16.msrb.mxu2 %v2236_v62  ;;  %v2835_v17 = vld [vmem:[#allocation8 + $0x1ac] sm:$0xf0]  ;;  %v2348_v18 = vor.u32 %v2871_v11, %v2347_v10  ;;  %v2491_v19 = vld [vmem:[#allocation8 + $0x3e0] sm:$0xf] }
  0x33   :  { %1333 = vmatpush.bf16.msrb.mxu3 %v2364_v4  ;;  %v2331_v21 = vld [vmem:[#allocation8 + $0x2a0] sm:$0xf]  ;;  %v2867_v22 = vld [vmem:[#allocation8 + $0x2ac] sm:$0xf0]  ;;  %v2204_v26 = vor.u32 %v2835_v17, %v2203_v16  ;;  %v2809_v16 = vld [vmem:[#allocation8 + $0xe4] sm:$0xf] }
  0x34   :  { %319 = vmatpush.bf16.msrb.mxu0 %v1967_v1  ;;  %v2907_v23 = vld [vmem:[#allocation8 + $0x3ec] sm:$0xf0]  ;;  %v2059_v24 = vld [vmem:[#allocation8 + $0x80] sm:$0xf]  ;;  %v2332_v30 = vor.u32 %v2867_v22, %v2331_v21 }
  0x35   :  { %1308 = vmatpush.bf16.msrb.mxu1 %v2092_v7  ;;  %v2799_v25 = vld [vmem:[#allocation8 + $0x8c] sm:$0xf0]  ;;  %v2187_v28 = vld [vmem:[#allocation8 + $0x180] sm:$0xf]  ;;  %v2492_v31 = vor.u32 %v2907_v23, %v2491_v19  ;;  %v2109_v19 = vld [vmem:[#allocation8 + $0xf0] sm:$0xf0] }
  0x36   :  { %1321 = vmatpush.bf16.msrb.mxu2 %v2220_v13  ;;  %v2831_v29 = vld [vmem:[#allocation8 + $0x18c] sm:$0xf0]  ;;  %v2060_v32 = vor.u32 %v2799_v25, %v2059_v24  ;;  %v2315_v33 = vld [vmem:[#allocation8 + $0x280] sm:$0xf]  ;;  %v2841_v25 = vld [vmem:[#allocation8 + $0x1e4] sm:$0xf] }
  0x37   :  { %1334 = vmatpush.bf16.msrb.mxu3 %v2348_v18  ;;  %v2863_v34 = vld [vmem:[#allocation8 + $0x28c] sm:$0xf0]  ;;  %v2043_v35 = vld [vmem:[#allocation8 + $0x60] sm:$0xf]  ;;  %v2188_v39 = vor.u32 %v2831_v29, %v2187_v28 }
  0x38   :  { %320 = vmatpush.bf16.msrb.mxu0 %v1947_v14  ;;  %v2795_v36 = vld [vmem:[#allocation8 + $0x6c] sm:$0xf0]  ;;  %v2475_v37 = vld [vmem:[#allocation8 + $0x3c0] sm:$0xf]  ;;  %v2316_v42 = vor.u32 %v2863_v34, %v2315_v33  ;;  %v2805_v34 = vld [vmem:[#allocation8 + $0xc4] sm:$0xf] }
  0x39   :  { %1309 = vmatpush.bf16.msrb.mxu1 %v2076_v20  ;;  %v2903_v38 = vld [vmem:[#allocation8 + $0x3cc] sm:$0xf0]  ;;  %v2171_v40 = vld [vmem:[#allocation8 + $0x160] sm:$0xf]  ;;  %v2044_v43 = vor.u32 %v2795_v36, %v2043_v35  ;;  %v2093_v35 = vld [vmem:[#allocation8 + $0xd0] sm:$0xf0] }
  0x3a   :  { %1322 = vmatpush.bf16.msrb.mxu2 %v2204_v26  ;;  %v2827_v41 = vld [vmem:[#allocation8 + $0x16c] sm:$0xf0]  ;;  %v2299_v44 = vld [vmem:[#allocation8 + $0x260] sm:$0xf]  ;;  %v2476_v46 = vor.u32 %v2903_v38, %v2475_v37  ;;  %v2237_v26 = vld [vmem:[#allocation8 + $0x1f0] sm:$0xf0] }
  0x3b   :  { %1335 = vmatpush.bf16.msrb.mxu3 %v2332_v30  ;;  %v2859_v45 = vld [vmem:[#allocation8 + $0x26c] sm:$0xf0]  ;;  %v2027_v47 = vld [vmem:[#allocation8 + $0x40] sm:$0xf]  ;;  %v2172_v51 = vor.u32 %v2827_v41, %v2171_v40  ;;  %v2240_v36 = vor.u32 %v2841_v25, %v2237_v26  ;;  %v2837_v40 = vld [vmem:[#allocation8 + $0x1c4] sm:$0xf] }
  0x3c   :  { %321 = vmatpush.bf16.msrb.mxu0 %v1927_v27  ;;  %v2791_v48 = vld [vmem:[#allocation8 + $0x4c] sm:$0xf0]  ;;  %v2459_v49 = vld [vmem:[#allocation8 + $0x3a0] sm:$0xf]  ;;  %v2300_v54 = vor.u32 %v2859_v45, %v2299_v44  ;;  %v2221_v41 = vld [vmem:[#allocation8 + $0x1d0] sm:$0xf0]  ;;  %v2096_v44 = vor.u32 %v2805_v34, %v2093_v35 }
  0x3d   :  { %1310 = vmatpush.bf16.msrb.mxu1 %v2060_v32  ;;  %v2899_v50 = vld [vmem:[#allocation8 + $0x3ac] sm:$0xf0]  ;;  %v2155_v52 = vld [vmem:[#allocation8 + $0x140] sm:$0xf]  ;;  %v2028_v56 = vor.u32 %v2791_v48, %v2027_v47  ;;  %v2801_v45 = vld [vmem:[#allocation8 + $0xa4] sm:$0xf]  ;;  %v2224_v47 = vor.u32 %v2837_v40, %v2221_v41 }
  0x3e   :  { %1323 = vmatpush.bf16.msrb.mxu2 %v2188_v39  ;;  %v2823_v53 = vld [vmem:[#allocation8 + $0x14c] sm:$0xf0]  ;;  %v2283_v57 = vld [vmem:[#allocation8 + $0x240] sm:$0xf]  ;;  %v2460_v59 = vor.u32 %v2899_v50, %v2459_v49  ;;  %v2825_v26 = vld [vmem:[#allocation8 + $0x164] sm:$0xf] }
  0x3f   :  { %1336 = vmatpush.bf16.msrb.mxu3 %v2316_v42  ;;  %1992 = vmatmul.msk.bf16.vlgmr.msrb.gmra.mxu0 %vm258_vm0, %v3236_v55  ;;  %v2855_v58 = vld [vmem:[#allocation8 + $0x24c] sm:$0xf0]  ;;  %v2011_v60 = vld [vmem:[#allocation8 + $0x20] sm:$0xf]  ;;  %v2156_v0 = vor.u32 %v2823_v53, %v2155_v52  ;;  %v2205_v52 = vld [vmem:[#allocation8 + $0x1b0] sm:$0xf0] }
  0x40   :  { %1346 = vmatpush.bf16.msra.mxu0 %v2492_v31  ;;  %v2787_v61 = vld [vmem:[#allocation8 + $0x2c] sm:$0xf0]  ;;  %v2443_v62 = vld [vmem:[#allocation8 + $0x380] sm:$0xf]  ;;  %v2284_v3 = vor.u32 %v2855_v58, %v2283_v57  ;;  %v2112_v31 = vor.u32 %v2809_v16, %v2109_v19  ;;  %v2873_v57 = vld [vmem:[#allocation8 + $0x2e4] sm:$0xf] }
  0x41   :  { %1311 = vmatpush.bf16.msrb.mxu1 %v2044_v43  ;;  %v2895_v63 = vld [vmem:[#allocation8 + $0x38c] sm:$0xf0]  ;;  %v2139_v1 = vld [vmem:[#allocation8 + $0x120] sm:$0xf]  ;;  %v2012_v4 = vor.u32 %v2787_v61, %v2011_v60  ;;  %v2365_v58 = vld [vmem:[#allocation8 + $0x2f0] sm:$0xf0] }
  0x42   :  { %1324 = vmatpush.bf16.msrb.mxu2 %v2172_v51  ;;  %v2819_v2 = vld [vmem:[#allocation8 + $0x12c] sm:$0xf0]  ;;  %v2267_v5 = vld [vmem:[#allocation8 + $0x220] sm:$0xf]  ;;  %v2444_v6 = vor.u32 %v2895_v63, %v2443_v62  ;;  %v2833_v51 = vld [vmem:[#allocation8 + $0x1a4] sm:$0xf] }
  0x43   :  { %1337 = vmatpush.bf16.msrb.mxu3 %v2300_v54  ;;  %v2851_v55 = vld [vmem:[#allocation8 + $0x22c] sm:$0xf0]  ;;  %v2427_v7 = vld [vmem:[#allocation8 + $0x360] sm:$0xf]  ;;  %v2140_v11 = vor.u32 %v2819_v2, %v2139_v1  ;;  %v2797_v60 = vld [vmem:[#allocation8 + $0x84] sm:$0xf]  ;;  %v2208_v62 = vor.u32 %v2833_v51, %v2205_v52 }
  0x44   :  { %1347 = vmatpush.bf16.msra.mxu0 %v2476_v46  ;;  %v1995_v8 = vld [vmem:[#allocation8] sm:$0xf]  ;;  %v2783_v9 = vld [vmem:[#allocation8 + $0xc] sm:$0xf0]  ;;  %v2268_v17 = vor.u32 %v2851_v55, %v2267_v5  ;;  %v2077_v46 = vld [vmem:[#allocation8 + $0xb0] sm:$0xf0] }
  0x45   :  { %1312 = vmatpush.bf16.msrb.mxu1 %v2028_v56  ;;  %v2891_v10 = vld [vmem:[#allocation8 + $0x36c] sm:$0xf0]  ;;  %v2619_v12 = vld [vmem:[#allocation8 + $0x4e0] sm:$0xf]  ;;  %v1996_v18 = vor.u32 %v2783_v9, %v1995_v8  ;;  %v2061_v61 = vld [vmem:[#allocation8 + $0x90] sm:$0xf0] }
  0x46   :  { %1325 = vmatpush.bf16.msrb.mxu2 %v2156_v0  ;;  %v2939_v13 = vld [vmem:[#allocation8 + $0x4ec] sm:$0xf0]  ;;  %v2123_v14 = vld [vmem:[#allocation8 + $0x100] sm:$0xf]  ;;  %v2428_v22 = vor.u32 %v2891_v10, %v2427_v7  ;;  %v2829_v1 = vld [vmem:[#allocation8 + $0x184] sm:$0xf]  ;;  %v2064_v7 = vor.u32 %v2797_v60, %v2061_v61 }
  0x47   :  { %1338 = vmatpush.bf16.msrb.mxu3 %v2284_v3  ;;  %v2815_v15 = vld [vmem:[#allocation8 + $0x10c] sm:$0xf0]  ;;  %v2251_v20 = vld [vmem:[#allocation8 + $0x200] sm:$0xf]  ;;  %v2620_v24 = vor.u32 %v2939_v13, %v2619_v12  ;;  %v2189_v2 = vld [vmem:[#allocation8 + $0x190] sm:$0xf0]  ;;  %v2368_v3 = vor.u32 %v2873_v57, %v2365_v58 }
  0x48   :  { %1348 = vmatpush.bf16.msra.mxu0 %v2460_v59  ;;  %v2847_v21 = vld [vmem:[#allocation8 + $0x20c] sm:$0xf0]  ;;  %v2411_v23 = vld [vmem:[#allocation8 + $0x340] sm:$0xf]  ;;  %v2124_v28 = vor.u32 %v2815_v15, %v2123_v14  ;;  %v2080_v59 = vor.u32 %v2801_v45, %v2077_v46  ;;  %v2869_v55 = vld [vmem:[#allocation8 + $0x2c4] sm:$0xf]  ;;  %v2192_v10 = vor.u32 %v2829_v1, %v2189_v2 }
  0x49   :  { %1313 = vmatpush.bf16.msrb.mxu1 %v2012_v4  ;;  %v2887_v27 = vld [vmem:[#allocation8 + $0x34c] sm:$0xf0]  ;;  %v2603_v29 = vld [vmem:[#allocation8 + $0x4c0] sm:$0xf]  ;;  %v2252_v32 = vor.u32 %v2847_v21, %v2251_v20  ;;  %v2793_v8 = vld [vmem:[#allocation8 + $0x64] sm:$0xf] }
  0x4a   :  { %1326 = vmatpush.bf16.msrb.mxu2 %v2140_v11  ;;  %v2935_v30 = vld [vmem:[#allocation8 + $0x4cc] sm:$0xf0]  ;;  %v2395_v33 = vld [vmem:[#allocation8 + $0x320] sm:$0xf]  ;;  %v2412_v37 = vor.u32 %v2887_v27, %v2411_v23  ;;  %v2045_v9 = vld [vmem:[#allocation8 + $0x70] sm:$0xf0] }
  0x4b   :  { %1339 = vmatpush.bf16.msrb.mxu3 %v2268_v17  ;;  %v2883_v38 = vld [vmem:[#allocation8 + $0x32c] sm:$0xf0]  ;;  %v2604_v39 = vor.u32 %v2935_v30, %v2603_v29  ;;  %v2587_v42 = vld [vmem:[#allocation8 + $0x4a0] sm:$0xf]  ;;  %v2865_v15 = vld [vmem:[#allocation8 + $0x2a4] sm:$0xf]  ;;  %v2048_v17 = vor.u32 %v2793_v8, %v2045_v9 }
  0x4c   :  { %1349 = vmatpush.bf16.msra.mxu0 %v2444_v6  ;;  %v2931_v43 = vld [vmem:[#allocation8 + $0x4ac] sm:$0xf0]  ;;  %v2396_v48 = vor.u32 %v2883_v38, %v2395_v33  ;;  %v2379_v49 = vld [vmem:[#allocation8 + $0x300] sm:$0xf]  ;;  %v2349_v6 = vld [vmem:[#allocation8 + $0x2d0] sm:$0xf0] }
  0x4d   :  { %1314 = vmatpush.bf16.msrb.mxu1 %v1996_v18  ;;  %v2588_v50 = vor.u32 %v2931_v43, %v2587_v42  ;;  %v2879_v53 = vld [vmem:[#allocation8 + $0x30c] sm:$0xf0]  ;;  %v2571_v54 = vld [vmem:[#allocation8 + $0x480] sm:$0xf]  ;;  %v2352_v12 = vor.u32 %v2869_v55, %v2349_v6  ;;  %v2333_v16 = vld [vmem:[#allocation8 + $0x2b0] sm:$0xf0] }
  0x4e   :  { %1327 = vmatpush.bf16.msrb.mxu2 %v2124_v28  ;;  %v2927_v56 = vld [vmem:[#allocation8 + $0x48c] sm:$0xf0]  ;;  %v2380_v63 = vor.u32 %v2879_v53, %v2379_v49  ;;  %v2555_v4 = vld [vmem:[#allocation8 + $0x460] sm:$0xf]  ;;  %v2789_v18 = vld [vmem:[#allocation8 + $0x44] sm:$0xf]  ;;  %v2336_v21 = vor.u32 %v2865_v15, %v2333_v16 }
  0x4f   :  { %1340 = vmatpush.bf16.msrb.mxu3 %v2252_v32  ;;  %v2572_v0 = vor.u32 %v2927_v56, %v2571_v54  ;;  %v2923_v5 = vld [vmem:[#allocation8 + $0x46c] sm:$0xf0]  ;;  %v2539_v13 = vld [vmem:[#allocation8 + $0x440] sm:$0xf]  ;;  %v2029_v19 = vld [vmem:[#allocation8 + $0x50] sm:$0xf0] }
  0x50   :  { %1350 = vmatpush.bf16.msra.mxu0 %v2428_v22  ;;  %v2556_v11 = vor.u32 %v2923_v5, %v2555_v4  ;;  %v2919_v14 = vld [vmem:[#allocation8 + $0x44c] sm:$0xf0]  ;;  %v2861_v22 = vld [vmem:[#allocation8 + $0x284] sm:$0xf]  ;;  %v2317_v23 = vld [vmem:[#allocation8 + $0x290] sm:$0xf0] }
  0x51   :  { %1359 = vmatpush.bf16.msra.mxu1 %v2620_v24  ;;  %v2540_v20 = vor.u32 %v2919_v14, %v2539_v13  ;;  %v2032_v24 = vor.u32 %v2789_v18, %v2029_v19  ;;  %v2320_v25 = vor.u32 %v2861_v22, %v2317_v23  ;;  %v2173_v27 = vld [vmem:[#allocation8 + $0x170] sm:$0xf0]  ;;  %v2857_v28 = vld [vmem:[#allocation8 + $0x264] sm:$0xf]  ;;  %v2523_v32 = vld [vmem:[#allocation8 + $0x420] sm:$0xf] }
  0x52   :  { %1372 = vmatpush.bf16.msra.mxu2 %v2112_v31  ;;  %v2176_v29 = vor.u32 %v2825_v26, %v2173_v27  ;;  %v2301_v30 = vld [vmem:[#allocation8 + $0x270] sm:$0xf0]  ;;  %v2915_v33 = vld [vmem:[#allocation8 + $0x42c] sm:$0xf0]  ;;  %v2785_v35 = vld [vmem:[#allocation8 + $0x24] sm:$0xf] }
  0x53   :  { %1385 = vmatpush.bf16.msra.mxu3 %v2240_v36  ;;  %v2304_v31 = vor.u32 %v2857_v28, %v2301_v30  ;;  %v2524_v34 = vor.u32 %v2915_v33, %v2523_v32  ;;  %v2013_v36 = vld [vmem:[#allocation8 + $0x30] sm:$0xf0]  ;;  %v2821_v38 = vld [vmem:[#allocation8 + $0x144] sm:$0xf]  ;;  %v2911_v45 = vld [vmem:[#allocation8 + $0x40c] sm:$0xf0] }
  0x54   :  { %1351 = vmatpush.bf16.msra.mxu0 %v2412_v37  ;;  %v2016_v37 = vor.u32 %v2785_v35, %v2013_v36  ;;  %v2853_v40 = vld [vmem:[#allocation8 + $0x244] sm:$0xf]  ;;  %v2285_v42 = vld [vmem:[#allocation8 + $0x250] sm:$0xf0]  ;;  %v2115_v26 = vld [vmem:[#allocation8 + $0xe8] sm:$0xf] }
  0x55   :  { %1360 = vmatpush.bf16.msra.mxu1 %v2604_v39  ;;  %v2157_v39 = vld [vmem:[#allocation8 + $0x150] sm:$0xf0]  ;;  %v2288_v43 = vor.u32 %v2853_v40, %v2285_v42  ;;  %v2781_v46 = vld [vmem:[#allocation8 + $0x4] sm:$0xf]  ;;  %v2812_v27 = vld [vmem:[#allocation8 + $0xf4] sm:$0xf0] }
  0x56   :  { %1373 = vmatpush.bf16.msra.mxu2 %v2096_v44  ;;  %v2160_v41 = vor.u32 %v2821_v38, %v2157_v39  ;;  %v2507_v44 = vld [vmem:[#allocation8 + $0x400] sm:$0xf]  ;;  %v2141_v51 = vld [vmem:[#allocation8 + $0x130] sm:$0xf0]  ;;  %v2849_v53 = vld [vmem:[#allocation8 + $0x224] sm:$0xf]  ;;  %v2116_v39 = vor.u32 %v2812_v27, %v2115_v26 }
  0x57   :  { %1386 = vmatpush.bf16.msra.mxu3 %v2224_v47  ;;  %v2508_v47 = vor.u32 %v2911_v45, %v2507_v44  ;;  %v2269_v54 = vld [vmem:[#allocation8 + $0x230] sm:$0xf0]  ;;  %v2813_v57 = vld [vmem:[#allocation8 + $0x104] sm:$0xf]  ;;  %v2243_v28 = vld [vmem:[#allocation8 + $0x1e8] sm:$0xf] }
  0x58   :  { %1352 = vmatpush.bf16.msra.mxu0 %v2396_v48  ;;  %v1997_v48 = vld [vmem:[#allocation8 + $0x10] sm:$0xf0]  ;;  %v2272_v56 = vor.u32 %v2849_v53, %v2269_v54  ;;  %v2845_v60 = vld [vmem:[#allocation8 + $0x204] sm:$0xf]  ;;  %v2844_v32 = vld [vmem:[#allocation8 + $0x1f4] sm:$0xf0] }
  0x59   :  { %1361 = vmatpush.bf16.msra.mxu1 %v2588_v50  ;;  %v2000_v49 = vor.u32 %v2781_v46, %v1997_v48  ;;  %v2817_v50 = vld [vmem:[#allocation8 + $0x124] sm:$0xf]  ;;  %v2125_v58 = vld [vmem:[#allocation8 + $0x110] sm:$0xf0]  ;;  %v2244_v42 = vor.u32 %v2844_v32, %v2243_v28  ;;  %v2099_v44 = vld [vmem:[#allocation8 + $0xc8] sm:$0xf] }
  0x5a   :  { %1374 = vmatpush.bf16.msra.mxu2 %v2080_v59  ;;  %v2144_v52 = vor.u32 %v2817_v50, %v2141_v51  ;;  %v2128_v59 = vor.u32 %v2813_v57, %v2125_v58  ;;  %v2253_v61 = vld [vmem:[#allocation8 + $0x210] sm:$0xf0]  ;;  %v2905_v5 = vld [vmem:[#allocation8 + $0x3e4] sm:$0xf]  ;;  %v2808_v45 = vld [vmem:[#allocation8 + $0xd4] sm:$0xf0] }
  0x5b   :  { %1387 = vmatpush.bf16.msra.mxu3 %v2208_v62  ;;  %v2256_v62 = vor.u32 %v2845_v60, %v2253_v61  ;;  %v2493_v55 = vld [vmem:[#allocation8 + $0x3f0] sm:$0xf0]  ;;  %v2901_v16 = vld [vmem:[#allocation8 + $0x3c4] sm:$0xf]  ;;  %v2227_v46 = vld [vmem:[#allocation8 + $0x1c8] sm:$0xf] }
  0x5c   :  { %1353 = vmatpush.bf16.msra.mxu0 %v2380_v63  ;;  %v3248_v63 = vld [vmem:[#allocation7] sm:$0x1f]  ;;  %v2621_v8 = vld [vmem:[#allocation8 + $0x4f0] sm:$0xf0]  ;;  %v2933_v19 = vld [vmem:[#allocation8 + $0x4c4] sm:$0xf] }
  0x5d   :  { %1362 = vmatpush.bf16.msra.mxu1 %v2572_v0  ;;  %v144_v0 = vperm.slane %v3248_v63, 0  ;;  %v145_v1 = vperm.slane %v3248_v63, 1  ;;  %v147_v14 = vperm.slane %v3248_v63, 3  ;;  %v2897_v33 = vld [vmem:[#allocation8 + $0x3a4] sm:$0xf]  ;;  %v148_v40 = vperm.slane %v3248_v63, 4 }
  0x5e   :  { %1375 = vmatpush.bf16.msra.mxu2 %v2064_v7  ;;  %v2937_v7 = vld [vmem:[#allocation8 + $0x4e4] sm:$0xf]  ;;  %v2445_v51 = vld [vmem:[#allocation8 + $0x390] sm:$0xf0]  ;;  %v2083_v61 = vld [vmem:[#allocation8 + $0xa8] sm:$0xf] }
  0x5f   :  { %1388 = vmatpush.bf16.msra.mxu3 %v2192_v10  ;;  %v2624_v15 = vor.u32 %v2937_v7, %v2621_v8  ;;  %v2929_v36 = vld [vmem:[#allocation8 + $0x4a4] sm:$0xf]  ;;  %v2573_v53 = vld [vmem:[#allocation8 + $0x490] sm:$0xf0] }
  0x60   :  { %1398 = vmatpush.bf16.msrb.mxu0 %v2368_v3  ;;  %v2893_v50 = vld [vmem:[#allocation8 + $0x384] sm:$0xf]  ;;  %v2397_v32 = vld [vmem:[#allocation8 + $0x330] sm:$0xf0] }
  0x61   :  { %1363 = vmatpush.bf16.msra.mxu1 %v2556_v11  ;;  %v146_v11 = vperm.slane %v3248_v63, 2  ;;  %v2448_v60 = vor.u32 %v2893_v50, %v2445_v51  ;;  %v2876_v51 = vld [vmem:[#allocation8 + $0x2f4] sm:$0xf0] }
  0x62   :  { %1376 = vmatpush.bf16.msra.mxu2 %v2048_v17  ;;  %v2477_v17 = vld [vmem:[#allocation8 + $0x3d0] sm:$0xf0] }
  0x63   :  { %1389 = vmatpush.bf16.msra.mxu3 %v2176_v29 }
  0x64   :  { %1399 = vmatpush.bf16.msrb.mxu0 %v2352_v12  ;;  %v2496_v12 = vor.u32 %v2905_v5, %v2493_v55  ;;  %v2921_v5 = vld [vmem:[#allocation8 + $0x464] sm:$0xf]  ;;  %v2557_v55 = vld [vmem:[#allocation8 + $0x470] sm:$0xf0] }
  0x65   :  { %1364 = vmatpush.bf16.msra.mxu1 %v2540_v20  ;;  %v2605_v20 = vld [vmem:[#allocation8 + $0x4d0] sm:$0xf0] }
  0x66   :  { %1377 = vmatpush.bf16.msra.mxu2 %v2032_v24 }
  0x67   :  { %1390 = vmatpush.bf16.msra.mxu3 %v2160_v41 }
  0x68   :  { %1400 = vmatpush.bf16.msrb.mxu0 %v2336_v21 }
  0x69   :  { %1365 = vmatpush.bf16.msra.mxu1 %v2524_v34  ;;  %v2461_v34 = vld [vmem:[#allocation8 + $0x3b0] sm:$0xf0] }
  0x6a   :  { %1378 = vmatpush.bf16.msra.mxu2 %v2016_v37  ;;  %v2589_v37 = vld [vmem:[#allocation8 + $0x4b0] sm:$0xf0] }
  0x6b   :  { %1391 = vmatpush.bf16.msra.mxu3 %v2144_v52  ;;  %v2592_v48 = vor.u32 %v2929_v36, %v2589_v37  ;;  %v2925_v52 = vld [vmem:[#allocation8 + $0x484] sm:$0xf]  ;;  %v2035_v37 = vld [vmem:[#allocation8 + $0x48] sm:$0xf] }
  0x6c   :  { %1401 = vmatpush.bf16.msrb.mxu0 %v2320_v25  ;;  %v2480_v25 = vor.u32 %v2901_v16, %v2477_v17  ;;  %v2832_v16 = vld [vmem:[#allocation8 + $0x194] sm:$0xf0]  ;;  %v2885_v17 = vld [vmem:[#allocation8 + $0x344] sm:$0xf] }
  0x6d   :  { %1366 = vmatpush.bf16.msra.mxu1 %v2508_v47 }
  0x6e   :  { %1379 = vmatpush.bf16.msra.mxu2 %v2000_v49  ;;  %v2840_v49 = vld [vmem:[#allocation8 + $0x1d4] sm:$0xf0] }
  0x6f   :  { %1392 = vmatpush.bf16.msra.mxu3 %v2128_v59  ;;  %v2228_v59 = vor.u32 %v2840_v49, %v2227_v46  ;;  %v2909_v46 = vld [vmem:[#allocation8 + $0x404] sm:$0xf]  ;;  %v2371_v49 = vld [vmem:[#allocation8 + $0x2e8] sm:$0xf] }
  0x70   :  { %1402 = vmatpush.bf16.msrb.mxu0 %v2304_v31  ;;  %v2608_v31 = vor.u32 %v2933_v19, %v2605_v20  ;;  %v2413_v19 = vld [vmem:[#allocation8 + $0x350] sm:$0xf0]  ;;  %v2917_v20 = vld [vmem:[#allocation8 + $0x444] sm:$0xf] }
  0x71   :  { %v2416_v27 = vor.u32 %v2885_v17, %v2413_v19  ;;  %v2339_v17 = vld [vmem:[#allocation8 + $0x2a8] sm:$0xf] }
  0x74   :  { %1403 = vmatpush.bf16.msrb.mxu0 %v2288_v43  ;;  %v2464_v43 = vor.u32 %v2897_v33, %v2461_v34  ;;  %v2913_v33 = vld [vmem:[#allocation8 + $0x424] sm:$0xf]  ;;  %v2525_v34 = vld [vmem:[#allocation8 + $0x430] sm:$0xf0] }
  0x78   :  { %1404 = vmatpush.bf16.msrb.mxu0 %v2272_v56  ;;  %v2100_v56 = vor.u32 %v2808_v45, %v2099_v44  ;;  %v2877_v44 = vld [vmem:[#allocation8 + $0x304] sm:$0xf]  ;;  %v2381_v45 = vld [vmem:[#allocation8 + $0x310] sm:$0xf0] }
  0x7c   :  { %1405 = vmatpush.bf16.msrb.mxu0 %v2256_v62  ;;  %v2804_v62 = vld [vmem:[#allocation8 + $0xb4] sm:$0xf0] }
  0x7d   :  { %v2084_v7 = vor.u32 %v2804_v62, %v2083_v61  ;;  %v2820_v61 = vld [vmem:[#allocation8 + $0x134] sm:$0xf0]  ;;  %v2372_v62 = vor.u32 %v2876_v51, %v2371_v49 }
  0x7e   :  { %v2892_v49 = vld [vmem:[#allocation8 + $0x374] sm:$0xf0] }
  0xac   :  { %v271_v2 = vpop.f32.mrf.mxu0 }
  0xad   :  { %v272_v3 = vadd.f32 %v271_v2, %v144_v0  ;;  %v284_v4 = vpop.f32.mrf.mxu1  ;;  %v2576_v0 = vor.u32 %v2925_v52, %v2573_v53  ;;  %v2836_v2 = vld [vmem:[#allocation8 + $0x1b4] sm:$0xf0]  ;;  %v2499_v52 = vld [vmem:[#allocation8 + $0x3e8] sm:$0xf] }
  0xae   :  { %v285_v6 = vadd.f32 %v284_v4, %v145_v1  ;;  %v2211_v1 = vld [vmem:[#allocation8 + $0x1a8] sm:$0xf]  ;;  %v2429_v4 = vld [vmem:[#allocation8 + $0x370] sm:$0xf0]  ;;  %v2908_v53 = vld [vmem:[#allocation8 + $0x3f4] sm:$0xf0] }
  0xaf   :  { %v327_v9 = vmax.f32 %v272_v3, 0.0  ;;  %v2889_v3 = vld [vmem:[#allocation8 + $0x364] sm:$0xf]  ;;  %v2212_v8 = vor.u32 %v2836_v2, %v2211_v1  ;;  %v2872_v2 = vld [vmem:[#allocation8 + $0x2d4] sm:$0xf0] }
  0xb0   :  { %v328_v10 = vmax.f32 %v285_v6, 0.0 }
  0xb1   :  { %v3253_v13 = vpack.c.bf16 %v327_v9, %v327_v9  ;;  %v2067_v9 = vld [vmem:[#allocation8 + $0x88] sm:$0xf] }
  0xb2   :  { %v3256_v18 = vpack.c.bf16 %v328_v10, %v328_v10  ;;  %v2800_v10 = vld [vmem:[#allocation8 + $0x94] sm:$0xf0] }
  0xb3   :  { %1315 = vmatmul.bf16.vlgmr.msrb.gmra.mxu1 %v3253_v13 }
  0xb4   :  { %v297_v21 = vpop.f32.mrf.mxu2  ;;  %1328 = vmatmul.bf16.vlgmr.msrb.gmra.mxu2 %v3256_v18  ;;  %1411 = vmatpush.bf16.msrb.mxu1 %v2496_v12  ;;  %v273_v24 = vpop.f32.mrf.mxu0  ;;  %v2432_v12 = vor.u32 %v2889_v3, %v2429_v4  ;;  %v2483_v3 = vld [vmem:[#allocation8 + $0x3c8] sm:$0xf]  ;;  %v2904_v4 = vld [vmem:[#allocation8 + $0x3d4] sm:$0xf0] }
  0xb5   :  { %v298_v22 = vadd.f32 %v297_v21, %v146_v11  ;;  %v310_v23 = vpop.f32.mrf.mxu3  ;;  %1424 = vmatpush.bf16.msrb.mxu2 %v2624_v15  ;;  %v286_v30 = vpop.f32.mrf.mxu1  ;;  %v2195_v15 = vld [vmem:[#allocation8 + $0x188] sm:$0xf]  ;;  %v2541_v21 = vld [vmem:[#allocation8 + $0x450] sm:$0xf0] }
  0xb6   :  { %v311_v29 = vadd.f32 %v310_v23, %v147_v14  ;;  %v2560_v14 = vor.u32 %v2921_v5, %v2557_v55  ;;  %v2196_v23 = vor.u32 %v2832_v16, %v2195_v15  ;;  %v2051_v24 = vld [vmem:[#allocation8 + $0x68] sm:$0xf]  ;;  %v2544_v28 = vor.u32 %v2917_v20, %v2541_v21  ;;  %v2828_v30 = vld [vmem:[#allocation8 + $0x174] sm:$0xf0]  ;;  %v2810_v15 = vld [vmem:[#allocation8 + $0xec] sm:$0xf] }
  0xb7   :  { %v329_v35 = vmax.f32 %v298_v22, 0.0  ;;  %v2068_v22 = vor.u32 %v2800_v10, %v2067_v9  ;;  %v2003_v55 = vld [vmem:[#allocation8 + $0x8] sm:$0xf]  ;;  %v2940_v10 = vld [vmem:[#allocation8 + $0x4f4] sm:$0xf0] }
  0xb8   :  { %v330_v38 = vmax.f32 %v311_v29, 0.0  ;;  %1412 = vmatpush.bf16.msrb.mxu1 %v2480_v25  ;;  %v2796_v25 = vld [vmem:[#allocation8 + $0x74] sm:$0xf0]  ;;  %v2179_v29 = vld [vmem:[#allocation8 + $0x168] sm:$0xf] }
  0xb9   :  { %v3261_v41 = vpack.c.bf16 %v329_v35, %v329_v35  ;;  %1425 = vmatpush.bf16.msrb.mxu2 %v2608_v31  ;;  %v2881_v31 = vld [vmem:[#allocation8 + $0x324] sm:$0xf]  ;;  %v2052_v35 = vor.u32 %v2796_v25, %v2051_v24  ;;  %v2180_v36 = vor.u32 %v2828_v30, %v2179_v29  ;;  %v2627_v9 = vld [vmem:[#allocation8 + $0x4e8] sm:$0xf]  ;;  %v2117_v16 = vld [vmem:[#allocation8 + $0xf8] sm:$0xf0] }
  0xba   :  { %v3263_v47 = vpack.c.bf16 %v330_v38, %v330_v38  ;;  %v2792_v38 = vld [vmem:[#allocation8 + $0x54] sm:$0xf0]  ;;  %v2467_v21 = vld [vmem:[#allocation8 + $0x3a8] sm:$0xf]  ;;  %v2628_v24 = vor.u32 %v2940_v10, %v2627_v9  ;;  %v2120_v25 = vor.u32 %v2810_v15, %v2117_v16  ;;  %v2806_v30 = vld [vmem:[#allocation8 + $0xcc] sm:$0xf] }
  0xbb   :  { %1341 = vmatmul.bf16.vlgmr.msrb.gmra.mxu3 %v3261_v41  ;;  %v2036_v50 = vor.u32 %v2792_v38, %v2035_v37  ;;  %v2868_v20 = vld [vmem:[#allocation8 + $0x2b4] sm:$0xf0]  ;;  %v2595_v38 = vld [vmem:[#allocation8 + $0x4a8] sm:$0xf]  ;;  %v2790_v16 = vld [vmem:[#allocation8 + $0x4c] sm:$0xf] }
  0xbc   :  { %1354 = vmatmul.bf16.vlgmr.msra.gmra.mxu0 %v3263_v47  ;;  %1437 = vmatpush.bf16.msrb.mxu3 %v2116_v39  ;;  %v299_v54 = vpop.f32.mrf.mxu2  ;;  %v323_v58 = vpop.f32.mrf.mxu0  ;;  %v2163_v39 = vld [vmem:[#allocation8 + $0x148] sm:$0xf]  ;;  %v2884_v9 = vld [vmem:[#allocation8 + $0x334] sm:$0xf0] }
  0xbd   :  { %1450 = vmatpush.bf16.msra.mxu0 %v2244_v42  ;;  %v312_v57 = vpop.f32.mrf.mxu3  ;;  %1413 = vmatpush.bf16.msrb.mxu1 %v2464_v43  ;;  %v324_v63 = vadd.f32 %v323_v58, %v148_v40  ;;  %v2400_v40 = vor.u32 %v2881_v31, %v2397_v32  ;;  %v2528_v42 = vor.u32 %v2913_v33, %v2525_v34  ;;  %v2824_v43 = vld [vmem:[#allocation8 + $0x154] sm:$0xf0]  ;;  %v2101_v31 = vld [vmem:[#allocation8 + $0xd8] sm:$0xf0]  ;;  %v2323_v32 = vld [vmem:[#allocation8 + $0x288] sm:$0xf] }
  0xbe   :  { %1426 = vmatpush.bf16.msrb.mxu2 %v2592_v48  ;;  %v2509_v48 = vld [vmem:[#allocation8 + $0x410] sm:$0xf0]  ;;  %v2164_v54 = vor.u32 %v2824_v43, %v2163_v39  ;;  %v2788_v57 = vld [vmem:[#allocation8 + $0x34] sm:$0xf0]  ;;  %v2384_v58 = vor.u32 %v2877_v44, %v2381_v45  ;;  %v2451_v34 = vld [vmem:[#allocation8 + $0x388] sm:$0xf]  ;;  %v2104_v37 = vor.u32 %v2806_v30, %v2101_v31 }
  0xbf   :  { %v331_v6 = vmax.f32 %v324_v63, 0.0  ;;  %v2500_v63 = vor.u32 %v2908_v53, %v2499_v52  ;;  %v2864_v33 = vld [vmem:[#allocation8 + $0x294] sm:$0xf0]  ;;  %v2802_v43 = vld [vmem:[#allocation8 + $0xac] sm:$0xf] }
  0xc0   :  { %1438 = vmatpush.bf16.msrb.mxu3 %v2100_v56  ;;  %v2019_v56 = vld [vmem:[#allocation8 + $0x28] sm:$0xf]  ;;  %v2932_v39 = vld [vmem:[#allocation8 + $0x4b4] sm:$0xf0]  ;;  %v2085_v44 = vld [vmem:[#allocation8 + $0xb8] sm:$0xf0] }
  0xc1   :  { %1451 = vmatpush.bf16.msra.mxu0 %v2228_v59  ;;  %1414 = vmatpush.bf16.msrb.mxu1 %v2448_v60  ;;  %v3267_v11 = vpack.c.bf16 %v331_v6, %v331_v6  ;;  %v2512_v59 = vor.u32 %v2909_v46, %v2509_v48  ;;  %v2147_v60 = vld [vmem:[#allocation8 + $0x128] sm:$0xf]  ;;  %v2020_v1 = vor.u32 %v2788_v57, %v2019_v56  ;;  %v2784_v6 = vld [vmem:[#allocation8 + $0x14] sm:$0xf0]  ;;  %v2798_v57 = vld [vmem:[#allocation8 + $0x8c] sm:$0xf] }
  0xc2   :  { %1427 = vmatpush.bf16.msrb.mxu2 %v2576_v0  ;;  %v2355_v0 = vld [vmem:[#allocation8 + $0x2c8] sm:$0xf]  ;;  %v2148_v5 = vor.u32 %v2820_v61, %v2147_v60  ;;  %v2004_v19 = vor.u32 %v2784_v6, %v2003_v55  ;;  %v2860_v46 = vld [vmem:[#allocation8 + $0x274] sm:$0xf0]  ;;  %v2088_v51 = vor.u32 %v2802_v43, %v2085_v44  ;;  %v2053_v55 = vld [vmem:[#allocation8 + $0x78] sm:$0xf0] }
  0xc3   :  { %1367 = vmatmul.bf16.vlgmr.msra.gmra.mxu1 %v3267_v11  ;;  %v2307_v45 = vld [vmem:[#allocation8 + $0x268] sm:$0xf]  ;;  %v2928_v53 = vld [vmem:[#allocation8 + $0x494] sm:$0xf0]  ;;  %v2870_v43 = vld [vmem:[#allocation8 + $0x2cc] sm:$0xf] }
  0xc4   :  { %1439 = vmatpush.bf16.msrb.mxu3 %v2084_v7  ;;  %1380 = vmatmul.bf16.vlgmr.msra.gmra.mxu2 %v3253_v13  ;;  %v325_v26 = vpop.f32.mrf.mxu0  ;;  %v2131_v7 = vld [vmem:[#allocation8 + $0x108] sm:$0xf]  ;;  %v2856_v60 = vld [vmem:[#allocation8 + $0x254] sm:$0xf0]  ;;  %v2357_v44 = vld [vmem:[#allocation8 + $0x2d8] sm:$0xf0] }
  0xc5   :  { %1452 = vmatpush.bf16.msra.mxu0 %v2212_v8  ;;  %1415 = vmatpush.bf16.msrb.mxu1 %v2432_v12  ;;  %v2816_v8 = vld [vmem:[#allocation8 + $0x114] sm:$0xf0]  ;;  %v2356_v12 = vor.u32 %v2872_v2, %v2355_v0  ;;  %v2611_v26 = vld [vmem:[#allocation8 + $0x4c8] sm:$0xf] }
  0xc6   :  { %1428 = vmatpush.bf16.msrb.mxu2 %v2560_v14  ;;  %v2484_v14 = vor.u32 %v2904_v4, %v2483_v3  ;;  %v2435_v48 = vld [vmem:[#allocation8 + $0x368] sm:$0xf]  ;;  %v2924_v2 = vld [vmem:[#allocation8 + $0x474] sm:$0xf0] }
  0xc7   :  { %v2579_v52 = vld [vmem:[#allocation8 + $0x488] sm:$0xf]  ;;  %v2436_v56 = vor.u32 %v2892_v49, %v2435_v48  ;;  %v2920_v15 = vld [vmem:[#allocation8 + $0x454] sm:$0xf0]  ;;  %v2782_v49 = vld [vmem:[#allocation8 + $0xc] sm:$0xf] }
  0xc8   :  { %1440 = vmatpush.bf16.msrb.mxu3 %v2068_v22  ;;  %v2900_v22 = vld [vmem:[#allocation8 + $0x3b4] sm:$0xf0]  ;;  %v2419_v61 = vld [vmem:[#allocation8 + $0x348] sm:$0xf] }
  0xc9   :  { %1453 = vmatpush.bf16.msra.mxu0 %v2196_v23  ;;  %1416 = vmatpush.bf16.msrb.mxu1 %v2416_v27  ;;  %v2132_v23 = vor.u32 %v2816_v8, %v2131_v7  ;;  %v2936_v27 = vld [vmem:[#allocation8 + $0x4d4] sm:$0xf0]  ;;  %v2468_v29 = vor.u32 %v2900_v22, %v2467_v21  ;;  %v2275_v6 = vld [vmem:[#allocation8 + $0x228] sm:$0xf] }
  0xca   :  { %1429 = vmatpush.bf16.msrb.mxu2 %v2544_v28  ;;  %v2340_v28 = vor.u32 %v2868_v20, %v2339_v17  ;;  %v2852_v7 = vld [vmem:[#allocation8 + $0x234] sm:$0xf0]  ;;  %v2403_v8 = vld [vmem:[#allocation8 + $0x328] sm:$0xf]  ;;  %v2037_v20 = vld [vmem:[#allocation8 + $0x58] sm:$0xf0] }
  0xcb   :  { %1393 = vmatmul.bf16.vlgmr.msra.gmra.mxu3 %v3256_v18  ;;  %v2276_v17 = vor.u32 %v2852_v7, %v2275_v6  ;;  %v2259_v21 = vld [vmem:[#allocation8 + $0x208] sm:$0xf]  ;;  %v2848_v22 = vld [vmem:[#allocation8 + $0x214] sm:$0xf0]  ;;  %v2040_v30 = vor.u32 %v2790_v16, %v2037_v20  ;;  %v2830_v7 = vld [vmem:[#allocation8 + $0x18c] sm:$0xf] }
  0xcc   :  { %1406 = vmatmul.bf16.vlgmr.msrb.gmra.mxu0 %v3261_v41  ;;  %1441 = vmatpush.bf16.msrb.mxu3 %v2052_v35  ;;  %v2896_v35 = vld [vmem:[#allocation8 + $0x394] sm:$0xf0]  ;;  %v2531_v31 = vld [vmem:[#allocation8 + $0x428] sm:$0xf]  ;;  %v2469_v16 = vld [vmem:[#allocation8 + $0x3b8] sm:$0xf0] }
  0xcd   :  { %1454 = vmatpush.bf16.msra.mxu0 %v2180_v36  ;;  %1417 = vmatpush.bf16.msrb.mxu1 %v2400_v40  ;;  %v2612_v36 = vor.u32 %v2936_v27, %v2611_v26  ;;  %v2324_v40 = vor.u32 %v2864_v33, %v2323_v32  ;;  %v2245_v27 = vld [vmem:[#allocation8 + $0x1f8] sm:$0xf0]  ;;  %v2916_v32 = vld [vmem:[#allocation8 + $0x434] sm:$0xf0]  ;;  %v2260_v33 = vor.u32 %v2848_v22, %v2259_v21  ;;  %v2826_v22 = vld [vmem:[#allocation8 + $0x16c] sm:$0xf] }
  0xce   :  { %1430 = vmatpush.bf16.msrb.mxu2 %v2528_v42  ;;  %v2452_v42 = vor.u32 %v2896_v35, %v2451_v34  ;;  %v2786_v35 = vld [vmem:[#allocation8 + $0x2c] sm:$0xf]  ;;  %v2912_v48 = vld [vmem:[#allocation8 + $0x414] sm:$0xf0]  ;;  %v2597_v20 = vld [vmem:[#allocation8 + $0x4b8] sm:$0xf0] }
  0xd0   :  { %1442 = vmatpush.bf16.msrb.mxu3 %v2036_v50  ;;  %v2596_v50 = vor.u32 %v2932_v39, %v2595_v38  ;;  %v2838_v39 = vld [vmem:[#allocation8 + $0x1cc] sm:$0xf] }
  0xd1   :  { %1455 = vmatpush.bf16.msra.mxu0 %v2164_v54  ;;  %1418 = vmatpush.bf16.msrb.mxu1 %v2384_v58  ;;  %v2308_v54 = vor.u32 %v2860_v46, %v2307_v45  ;;  %v2069_v58 = vld [vmem:[#allocation8 + $0x98] sm:$0xf0]  ;;  %v2515_v46 = vld [vmem:[#allocation8 + $0x408] sm:$0xf] }
  0xd2   :  { %1431 = vmatpush.bf16.msrb.mxu2 %v2512_v59  ;;  %v2291_v59 = vld [vmem:[#allocation8 + $0x248] sm:$0xf]  ;;  %v2072_v0 = vor.u32 %v2798_v57, %v2069_v58  ;;  %v2629_v57 = vld [vmem:[#allocation8 + $0x4f8] sm:$0xf0]  ;;  %v2516_v58 = vor.u32 %v2912_v48, %v2515_v46  ;;  %v2818_v46 = vld [vmem:[#allocation8 + $0x12c] sm:$0xf] }
  0xd3   :  { %v2292_v3 = vor.u32 %v2856_v60, %v2291_v59  ;;  %v2834_v59 = vld [vmem:[#allocation8 + $0x1ac] sm:$0xf]  ;;  %v2213_v60 = vld [vmem:[#allocation8 + $0x1b8] sm:$0xf0] }
  0xd4   :  { %1443 = vmatpush.bf16.msrb.mxu3 %v2020_v1  ;;  %1419 = vmatmul.bf16.vlgmr.msrb.gmra.mxu1 %v3263_v47  ;;  %v2563_v1 = vld [vmem:[#allocation8 + $0x468] sm:$0xf]  ;;  %v2149_v48 = vld [vmem:[#allocation8 + $0x138] sm:$0xf0] }
  0xd5   :  { %1463 = vmatpush.bf16.msra.mxu1 %v2372_v62  ;;  %1456 = vmatpush.bf16.msra.mxu0 %v2148_v5  ;;  %v2888_v62 = vld [vmem:[#allocation8 + $0x354] sm:$0xf0]  ;;  %v2794_v5 = vld [vmem:[#allocation8 + $0x6c] sm:$0xf]  ;;  %v2564_v10 = vor.u32 %v2924_v2, %v2563_v1 }
  0xd6   :  { %1476 = vmatpush.bf16.msra.mxu2 %v2500_v63  ;;  %v2580_v63 = vor.u32 %v2928_v53, %v2579_v52  ;;  %v2420_v4 = vor.u32 %v2888_v62, %v2419_v61  ;;  %v2501_v52 = vld [vmem:[#allocation8 + $0x3f8] sm:$0xf0]  ;;  %v2902_v2 = vld [vmem:[#allocation8 + $0x3cc] sm:$0xf] }
  0xd7   :  { %1432 = vmatmul.bf16.vlgmr.msrb.gmra.mxu2 %v3267_v11 }
  0xd8   :  { %1444 = vmatpush.bf16.msrb.mxu3 %v2004_v19  ;;  %v2404_v19 = vor.u32 %v2884_v9, %v2403_v8  ;;  %v2197_v8 = vld [vmem:[#allocation8 + $0x198] sm:$0xf0] }
  0xd9   :  { %1464 = vmatpush.bf16.msra.mxu1 %v2356_v12  ;;  %1457 = vmatpush.bf16.msra.mxu0 %v2132_v23  ;;  %v2056_v12 = vor.u32 %v2794_v5, %v2053_v55  ;;  %v2387_v23 = vld [vmem:[#allocation8 + $0x308] sm:$0xf]  ;;  %v2934_v5 = vld [vmem:[#allocation8 + $0x4cc] sm:$0xf]  ;;  %v2613_v55 = vld [vmem:[#allocation8 + $0x4d8] sm:$0xf0] }
  0xda   :  { %1477 = vmatpush.bf16.msra.mxu2 %v2484_v14  ;;  %v2547_v14 = vld [vmem:[#allocation8 + $0x448] sm:$0xf] }
  0xdb   :  { %1445 = vmatmul.bf16.vlgmr.msrb.gmra.mxu3 %v3253_v13  ;;  %v2548_v26 = vor.u32 %v2920_v15, %v2547_v14  ;;  %v2616_v14 = vor.u32 %v2934_v5, %v2613_v55  ;;  %v2898_v15 = vld [vmem:[#allocation8 + $0x3ac] sm:$0xf]  ;;  %v2533_v55 = vld [vmem:[#allocation8 + $0x438] sm:$0xf0] }
  0xdc   :  { %1489 = vmatpush.bf16.msra.mxu3 %v2628_v24  ;;  %1458 = vmatmul.bf16.vlgmr.msra.gmra.mxu0 %v3256_v18  ;;  %v2880_v24 = vld [vmem:[#allocation8 + $0x314] sm:$0xf0]  ;;  %v2914_v5 = vld [vmem:[#allocation8 + $0x42c] sm:$0xf] }
  0xdd   :  { %1502 = vmatpush.bf16.msrb.mxu0 %v2120_v25  ;;  %1465 = vmatpush.bf16.msra.mxu1 %v2340_v28  ;;  %v2842_v25 = vld [vmem:[#allocation8 + $0x1ec] sm:$0xf]  ;;  %v2388_v34 = vor.u32 %v2880_v24, %v2387_v23  ;;  %v2181_v23 = vld [vmem:[#allocation8 + $0x178] sm:$0xf0]  ;;  %v2472_v24 = vor.u32 %v2898_v15, %v2469_v16  ;;  %v2947_v16 = vld [vmem:[#allocation11 + $0x30] sm:$0xff] }
  0xde   :  { %1478 = vmatpush.bf16.msra.mxu2 %v2468_v29  ;;  %v2874_v28 = vld [vmem:[#allocation8 + $0x2ec] sm:$0xf]  ;;  %v2373_v29 = vld [vmem:[#allocation8 + $0x2f8] sm:$0xf0] }
  0xdf   :  { %v2376_v38 = vor.u32 %v2874_v28, %v2373_v29  ;;  %v2894_v28 = vld [vmem:[#allocation8 + $0x38c] sm:$0xf]  ;;  %v2453_v29 = vld [vmem:[#allocation8 + $0x398] sm:$0xf0] }
  0xe0   :  { %1490 = vmatpush.bf16.msra.mxu3 %v2612_v36  ;;  %v2021_v36 = vld [vmem:[#allocation8 + $0x38] sm:$0xf0] }
  0xe1   :  { %1503 = vmatpush.bf16.msrb.mxu0 %v2104_v37  ;;  %1466 = vmatpush.bf16.msra.mxu1 %v2324_v40  ;;  %v2248_v37 = vor.u32 %v2842_v25, %v2245_v27  ;;  %v2532_v40 = vor.u32 %v2916_v32, %v2531_v31  ;;  %v2024_v45 = vor.u32 %v2786_v35, %v2021_v36  ;;  %v2858_v25 = vld [vmem:[#allocation8 + $0x26c] sm:$0xf]  ;;  %v2581_v32 = vld [vmem:[#allocation8 + $0x498] sm:$0xf0] }
  0xe2   :  { %1479 = vmatpush.bf16.msra.mxu2 %v2452_v42  ;;  %v2229_v42 = vld [vmem:[#allocation8 + $0x1d8] sm:$0xf0]  ;;  %v2926_v31 = vld [vmem:[#allocation8 + $0x48c] sm:$0xf]  ;;  %v2456_v35 = vor.u32 %v2894_v28, %v2453_v29 }
  0xe3   :  { %v2232_v53 = vor.u32 %v2838_v39, %v2229_v42  ;;  %v2854_v36 = vld [vmem:[#allocation8 + $0x24c] sm:$0xf]  ;;  %v2517_v15 = vld [vmem:[#allocation8 + $0x418] sm:$0xf0] }
  0xe4   :  { %1491 = vmatpush.bf16.msra.mxu3 %v2596_v50  ;;  %v2005_v50 = vld [vmem:[#allocation8 + $0x18] sm:$0xf0]  ;;  %v2890_v39 = vld [vmem:[#allocation8 + $0x36c] sm:$0xf] }
  0xe5   :  { %1504 = vmatpush.bf16.msrb.mxu0 %v2088_v51  ;;  %1467 = vmatpush.bf16.msra.mxu1 %v2308_v54  ;;  %v2906_v51 = vld [vmem:[#allocation8 + $0x3ec] sm:$0xf]  ;;  %v2360_v54 = vor.u32 %v2870_v43, %v2357_v44  ;;  %v2008_v61 = vor.u32 %v2782_v49, %v2005_v50  ;;  %v2565_v44 = vld [vmem:[#allocation8 + $0x478] sm:$0xf0] }
  0xe6   :  { %1480 = vmatpush.bf16.msra.mxu2 %v2436_v56  ;;  %v2938_v56 = vld [vmem:[#allocation8 + $0x4ec] sm:$0xf]  ;;  %v2504_v62 = vor.u32 %v2906_v51, %v2501_v52  ;;  %v2277_v51 = vld [vmem:[#allocation8 + $0x238] sm:$0xf0] }
  0xe7   :  { %v2632_v1 = vor.u32 %v2938_v56, %v2629_v57  ;;  %v2922_v43 = vld [vmem:[#allocation8 + $0x46c] sm:$0xf]  ;;  %v2152_v56 = vor.u32 %v2818_v46, %v2149_v48 }
  0xe8   :  { %1492 = vmatpush.bf16.msra.mxu3 %v2580_v63  ;;  %v2866_v63 = vld [vmem:[#allocation8 + $0x2ac] sm:$0xf]  ;;  %v2568_v52 = vor.u32 %v2922_v43, %v2565_v44  ;;  %v2964_v44 = vld [vmem:[#allocation11 + $0xb8] sm:$0xff] }
  0xe9   :  { %1505 = vmatpush.bf16.msrb.mxu0 %v2072_v0  ;;  %1468 = vmatpush.bf16.msra.mxu1 %v2292_v3  ;;  %v2341_v0 = vld [vmem:[#allocation8 + $0x2b8] sm:$0xf0]  ;;  %v2850_v50 = vld [vmem:[#allocation8 + $0x22c] sm:$0xf] }
  0xea   :  { %1481 = vmatpush.bf16.msra.mxu2 %v2420_v4  ;;  %v2485_v3 = vld [vmem:[#allocation8 + $0x3d8] sm:$0xf0]  ;;  %v2216_v4 = vor.u32 %v2834_v59, %v2213_v60  ;;  %v2344_v6 = vor.u32 %v2866_v63, %v2341_v0  ;;  %v2918_v57 = vld [vmem:[#allocation8 + $0x44c] sm:$0xf]  ;;  %v2280_v59 = vor.u32 %v2850_v50, %v2277_v51 }
  0xeb   :  { %v2488_v9 = vor.u32 %v2902_v2, %v2485_v3  ;;  %v2814_v60 = vld [vmem:[#allocation8 + $0x10c] sm:$0xf]  ;;  %v2261_v0 = vld [vmem:[#allocation8 + $0x218] sm:$0xf0] }
  0xec   :  { %1493 = vmatpush.bf16.msra.mxu3 %v2564_v10  ;;  %v2862_v10 = vld [vmem:[#allocation8 + $0x28c] sm:$0xf]  ;;  %v2405_v3 = vld [vmem:[#allocation8 + $0x338] sm:$0xf0] }
  0xed   :  { %1506 = vmatpush.bf16.msrb.mxu0 %v2056_v12  ;;  %1469 = vmatpush.bf16.msra.mxu1 %v2276_v17  ;;  %v2325_v12 = vld [vmem:[#allocation8 + $0x298] sm:$0xf0]  ;;  %v2200_v17 = vor.u32 %v2830_v7, %v2197_v8  ;;  %v2846_v63 = vld [vmem:[#allocation8 + $0x20c] sm:$0xf] }
  0xee   :  { %1482 = vmatpush.bf16.msra.mxu2 %v2404_v19  ;;  %v2930_v19 = vld [vmem:[#allocation8 + $0x4ac] sm:$0xf]  ;;  %v2328_v21 = vor.u32 %v2862_v10, %v2325_v12  ;;  %v2948_v7 = vld [vmem:[#allocation11 + $0x38] sm:$0xff] }
  0xef   :  { %v2600_v27 = vor.u32 %v2930_v19, %v2597_v20  ;;  %v2882_v2 = vld [vmem:[#allocation8 + $0x32c] sm:$0xf]  ;;  %v2389_v12 = vld [vmem:[#allocation8 + $0x318] sm:$0xf0] }
  0xf0   :  { %1494 = vmatpush.bf16.msra.mxu3 %v2548_v26  ;;  %v2309_v26 = vld [vmem:[#allocation8 + $0x278] sm:$0xf0]  ;;  %v2408_v8 = vor.u32 %v2882_v2, %v2405_v3  ;;  %v2878_v10 = vld [vmem:[#allocation8 + $0x30c] sm:$0xf]  ;;  %v2959_v3 = vld [vmem:[#allocation11 + $0x90] sm:$0xff] }
  0xf1   :  { %1507 = vmatpush.bf16.msrb.mxu0 %v2040_v30  ;;  %1470 = vmatpush.bf16.msra.mxu1 %v2260_v33  ;;  %v2184_v30 = vor.u32 %v2826_v22, %v2181_v23  ;;  %v2312_v33 = vor.u32 %v2858_v25, %v2309_v26  ;;  %v2946_v20 = vld [vmem:[#allocation11 + $0x28] sm:$0xff]  ;;  %v2944_v22 = vld [vmem:[#allocation11 + $0x18] sm:$0xff]  ;;  %v2943_v23 = vld [vmem:[#allocation11 + $0x10] sm:$0xff] }
  0xf2   :  { %1483 = vmatpush.bf16.msra.mxu2 %v2388_v34  ;;  %v2822_v34 = vld [vmem:[#allocation8 + $0x14c] sm:$0xf]  ;;  %v2955_v25 = vld [vmem:[#allocation11 + $0x70] sm:$0xff] }
  0xf3   :  { %v2954_v26 = vld [vmem:[#allocation11 + $0x68] sm:$0xff] }
  0xf4   :  { %1495 = vmatpush.bf16.msra.mxu3 %v2532_v40  ;;  %1471 = vmatmul.bf16.vlgmr.msra.gmra.mxu1 %v3261_v41  ;;  %v2437_v40 = vld [vmem:[#allocation8 + $0x378] sm:$0xf0] }
  0xf5   :  { %1515 = vmatpush.bf16.msrb.mxu1 %v2248_v37  ;;  %1508 = vmatpush.bf16.msrb.mxu0 %v2024_v45  ;;  %v2293_v37 = vld [vmem:[#allocation8 + $0x258] sm:$0xf0]  ;;  %v2440_v49 = vor.u32 %v2890_v39, %v2437_v40 }
  0xf6   :  { %1528 = vmatpush.bf16.msrb.mxu2 %v2376_v38  ;;  %v2584_v38 = vor.u32 %v2926_v31, %v2581_v32  ;;  %v2296_v45 = vor.u32 %v2854_v36, %v2293_v37  ;;  %v2949_v36 = vld [vmem:[#allocation11 + $0x40] sm:$0xff] }
  0xf7   :  { %1484 = vmatmul.bf16.vlgmr.msra.gmra.mxu2 %v3263_v47 }
  0xf8   :  { %1496 = vmatpush.bf16.msra.mxu3 %v2516_v58  ;;  %v2549_v58 = vld [vmem:[#allocation8 + $0x458] sm:$0xf0] }
  0xf9   :  { %1516 = vmatpush.bf16.msrb.mxu1 %v2232_v53  ;;  %1509 = vmatpush.bf16.msrb.mxu0 %v2008_v61  ;;  %v2886_v53 = vld [vmem:[#allocation8 + $0x34c] sm:$0xf]  ;;  %v2133_v61 = vld [vmem:[#allocation8 + $0x118] sm:$0xf0] }
  0xfa   :  { %1529 = vmatpush.bf16.msrb.mxu2 %v2360_v54  ;;  %v2421_v54 = vld [vmem:[#allocation8 + $0x358] sm:$0xf0] }
  0xfb   :  { %1497 = vmatmul.bf16.vlgmr.msra.gmra.mxu3 %v3267_v11 }
  0xfc   :  { %1541 = vmatpush.bf16.msrb.mxu3 %v2504_v62  ;;  %1510 = vmatmul.bf16.vlgmr.msrb.gmra.mxu0 %v3253_v13  ;;  %v2165_v13 = vld [vmem:[#allocation8 + $0x158] sm:$0xf0]  ;;  %v2424_v62 = vor.u32 %v2886_v53, %v2421_v54 }
  0xfd   :  { %1554 = vmatpush.bf16.msra.mxu0 %v2632_v1  ;;  %1517 = vmatpush.bf16.msrb.mxu1 %v2216_v4  ;;  %v2168_v42 = vor.u32 %v2822_v34, %v2165_v13  ;;  %v2552_v1 = vor.u32 %v2918_v57, %v2549_v58  ;;  %v2136_v4 = vor.u32 %v2814_v60, %v2133_v61 }
  0xfe   :  { %1530 = vmatpush.bf16.msrb.mxu2 %v2344_v6  ;;  %v2264_v6 = vor.u32 %v2846_v63, %v2261_v0 }
 0x100   :  { %1542 = vmatpush.bf16.msrb.mxu3 %v2488_v9  ;;  %v2536_v9 = vor.u32 %v2914_v5, %v2533_v55 }
 0x101   :  { %1555 = vmatpush.bf16.msra.mxu0 %v2616_v14  ;;  %1518 = vmatpush.bf16.msrb.mxu1 %v2200_v17  ;;  %v2910_v14 = vld [vmem:[#allocation8 + $0x40c] sm:$0xf]  ;;  %v2392_v17 = vor.u32 %v2878_v10, %v2389_v12  ;;  %v2957_v12 = vld [vmem:[#allocation11 + $0x80] sm:$0xff] }
 0x102   :  { %1531 = vmatpush.bf16.msrb.mxu2 %v2328_v21  ;;  %v2520_v19 = vor.u32 %v2910_v14, %v2517_v15  ;;  %v2945_v21 = vld [vmem:[#allocation11 + $0x20] sm:$0xff] }
 0x104   :  { %1543 = vmatpush.bf16.msrb.mxu3 %v2472_v24  ;;  %v2956_v24 = vld [vmem:[#allocation11 + $0x78] sm:$0xff] }
 0x105   :  { %1556 = vmatpush.bf16.msra.mxu0 %v2600_v27  ;;  %1519 = vmatpush.bf16.msrb.mxu1 %v2184_v30  ;;  %v3285_v27 = vld [vmem:[#allocation10] sm:$0xf]  ;;  %v2951_v30 = vld [vmem:[#allocation11 + $0x50] sm:$0xff] }
 0x106   :  { %1532 = vmatpush.bf16.msrb.mxu2 %v2312_v33  ;;  %v499_v29 = vperm.slane %v3285_v27, 0  ;;  %v2950_v33 = vld [vmem:[#allocation11 + $0x48] sm:$0xff] }
 0x108   :  { %1544 = vmatpush.bf16.msrb.mxu3 %v2456_v35 }
 0x109   :  { %1557 = vmatpush.bf16.msra.mxu0 %v2584_v38  ;;  %1520 = vmatpush.bf16.msrb.mxu1 %v2168_v42 }
 0x10a   :  { %1533 = vmatpush.bf16.msrb.mxu2 %v2296_v45 }
 0x10c   :  { %1545 = vmatpush.bf16.msrb.mxu3 %v2440_v49  ;;  %v2963_v49 = vld [vmem:[#allocation11 + $0xb0] sm:$0xff] }
 0x10d   :  { %1558 = vmatpush.bf16.msra.mxu0 %v2568_v52  ;;  %1521 = vmatpush.bf16.msrb.mxu1 %v2152_v56  ;;  %v2962_v52 = vld [vmem:[#allocation11 + $0xa8] sm:$0xff]  ;;  %v500_v56 = vperm.slane %v3285_v27, 1 }
 0x10e   :  { %1534 = vmatpush.bf16.msrb.mxu2 %v2280_v59  ;;  %v2961_v59 = vld [vmem:[#allocation11 + $0xa0] sm:$0xff] }
 0x110   :  { %1546 = vmatpush.bf16.msrb.mxu3 %v2424_v62  ;;  %v2960_v62 = vld [vmem:[#allocation11 + $0x98] sm:$0xff] }
 0x111   :  { %1559 = vmatpush.bf16.msra.mxu0 %v2552_v1  ;;  %1522 = vmatpush.bf16.msrb.mxu1 %v2136_v4 }
 0x112   :  { %1535 = vmatpush.bf16.msrb.mxu2 %v2264_v6 }
 0x114   :  { %1547 = vmatpush.bf16.msrb.mxu3 %v2408_v8  ;;  %1523 = vmatmul.bf16.vlgmr.msrb.gmra.mxu1 %v3256_v18  ;;  %v2942_v18 = vld [vmem:[#allocation11 + $0x8] sm:$0xff] }
 0x115   :  { %1835 = vmatpush.bf16.msra.mxu1 %v2948_v7  ;;  %1560 = vmatpush.bf16.msra.mxu0 %v2536_v9  ;;  %v2958_v8 = vld [vmem:[#allocation11 + $0x88] sm:$0xff] }
 0x116   :  { %1536 = vmatmul.bf16.vlgmr.msrb.gmra.mxu2 %v3261_v41  ;;  %v2941_v41 = vld [vmem:[#allocation11] sm:$0xff] }
 0x117   :  { %1848 = vmatpush.bf16.msra.mxu2 %v2956_v24 }
 0x118   :  { %1548 = vmatpush.bf16.msrb.mxu3 %v2392_v17  ;;  %v2972_v17 = vld [vmem:[#allocation11 + $0xf8] sm:$0xff] }
 0x119   :  { %1836 = vmatpush.bf16.msra.mxu1 %v2947_v16  ;;  %1561 = vmatpush.bf16.msra.mxu0 %v2520_v19  ;;  %v2971_v19 = vld [vmem:[#allocation11 + $0xf0] sm:$0xff] }
 0x11b   :  { %1549 = vmatmul.bf16.vlgmr.msrb.gmra.mxu3 %v3263_v47  ;;  %1849 = vmatpush.bf16.msra.mxu2 %v2955_v25  ;;  %v2953_v47 = vld [vmem:[#allocation11 + $0x60] sm:$0xff] }
 0x11c   :  { %1562 = vmatmul.bf16.vlgmr.msra.gmra.mxu0 %v3267_v11  ;;  %v2952_v11 = vld [vmem:[#allocation11 + $0x58] sm:$0xff]  ;;  %1861 = vmatpush.bf16.msra.mxu3 %v2964_v44 }
 0x11d   :  { %1837 = vmatpush.bf16.msra.mxu1 %v2946_v20  ;;  %1874 = vmatpush.bf16.msrb.mxu0 %v2972_v17 }
 0x11f   :  { %1850 = vmatpush.bf16.msra.mxu2 %v2954_v26 }
 0x120   :  { %1862 = vmatpush.bf16.msra.mxu3 %v2963_v49 }
 0x121   :  { %1838 = vmatpush.bf16.msra.mxu1 %v2945_v21  ;;  %1875 = vmatpush.bf16.msrb.mxu0 %v2971_v19  ;;  %v2970_v21 = vld [vmem:[#allocation11 + $0xe8] sm:$0xff] }
 0x123   :  { %1851 = vmatpush.bf16.msra.mxu2 %v2953_v47 }
 0x124   :  { %1863 = vmatpush.bf16.msra.mxu3 %v2962_v52 }
 0x125   :  { %1839 = vmatpush.bf16.msra.mxu1 %v2944_v22  ;;  %1876 = vmatpush.bf16.msrb.mxu0 %v2970_v21  ;;  %v2969_v22 = vld [vmem:[#allocation11 + $0xe0] sm:$0xff] }
 0x127   :  { %1852 = vmatpush.bf16.msra.mxu2 %v2952_v11 }
 0x128   :  { %1864 = vmatpush.bf16.msra.mxu3 %v2961_v59 }
 0x129   :  { %1840 = vmatpush.bf16.msra.mxu1 %v2943_v23  ;;  %v501_v23 = vperm.slane %v3285_v27, 2  ;;  %1877 = vmatpush.bf16.msrb.mxu0 %v2969_v22 }
 0x12b   :  { %1853 = vmatpush.bf16.msra.mxu2 %v2951_v30  ;;  %v2966_v30 = vld [vmem:[#allocation11 + $0xc8] sm:$0xff] }
 0x12c   :  { %1865 = vmatpush.bf16.msra.mxu3 %v2960_v62 }
 0x12d   :  { %1841 = vmatpush.bf16.msra.mxu1 %v2942_v18  ;;  %v2968_v18 = vld [vmem:[#allocation11 + $0xd8] sm:$0xff] }
 0x12e   :  { %1878 = vmatpush.bf16.msrb.mxu0 %v2968_v18 }
 0x12f   :  { %1854 = vmatpush.bf16.msra.mxu2 %v2950_v33 }
 0x130   :  { %v1316_v28 = vpop.f32.mrf.mxu1  ;;  %1866 = vmatpush.bf16.msra.mxu3 %v2959_v3 }
 0x131   :  { %1842 = vmatpush.bf16.msra.mxu1 %v2941_v41  ;;  %v1317_v31 = vadd.f32 %v1316_v28, %v499_v29  ;;  %v2967_v41 = vld [vmem:[#allocation11 + $0xd0] sm:$0xff] }
 0x132   :  { %1879 = vmatpush.bf16.msrb.mxu0 %v2967_v41 }
 0x133   :  { %1855 = vmatpush.bf16.msra.mxu2 %v2949_v36 }
 0x134   :  { %1867 = vmatpush.bf16.msra.mxu3 %v2958_v8 }
 0x136   :  { %1880 = vmatpush.bf16.msrb.mxu0 %v2966_v30 }
 0x137   :  { %v1329_v32 = vpop.f32.mrf.mxu2 }
 0x138   :  { %v1318_v13 = vpop.f32.mrf.mxu1  ;;  %v1330_v35 = vadd.f32 %v1329_v32, %v1317_v31  ;;  %1868 = vmatpush.bf16.msra.mxu3 %v2957_v12 }
 0x139   :  { %v1355_v34 = vpop.f32.mrf.mxu0 }
 0x13e   :  { %v1342_v37 = vpop.f32.mrf.mxu3 }
 0x13f   :  { %v1343_v38 = vadd.f32 %v1342_v37, %v1330_v35  ;;  %v1331_v39 = vpop.f32.mrf.mxu2 }
 0x140   :  { %v1368_v43 = vpop.f32.mrf.mxu1 }
 0x141   :  { %v1357_v40 = vpop.f32.mrf.mxu0  ;;  %v1356_v42 = vadd.f32 %v1355_v34, %v1343_v38  ;;  %v2965_v34 = vld [vmem:[#allocation11 + $0xc0] sm:$0xff] }
 0x142   :  { %1881 = vmatpush.bf16.msrb.mxu0 %v2965_v34  ;;  %v502_v40 = vperm.slane %v3285_v27, 3 }
 0x143   :  { %v1369_v45 = vadd.f32 %v1368_v43, %v1356_v42 }
 0x145   :  { %v1567_v46 = vmax.f32 %v1369_v45, 0.0 }
 0x146   :  { %v1344_v48 = vpop.f32.mrf.mxu3 }
 0x147   :  { %v1571_v50 = vpack.c.bf16 %v1567_v46, %v1567_v46  ;;  %v1381_v51 = vpop.f32.mrf.mxu2 }
 0x148   :  { %v1370_v54 = vpop.f32.mrf.mxu1  ;;  %v1382_v57 = vadd.f32 %v1381_v51, %v500_v56 }
 0x149   :  { %v1407_v53 = vpop.f32.mrf.mxu0  ;;  %1843 = vmatmul.bf16.vlgmr.msra.gmra.mxu1 %v1571_v50 }
 0x14e   :  { %v1394_v58 = vpop.f32.mrf.mxu3 }
 0x14f   :  { %v1395_v60 = vadd.f32 %v1394_v58, %v1382_v57  ;;  %v1383_v61 = vpop.f32.mrf.mxu2 }
 0x151   :  { %v1409_v63 = vpop.f32.mrf.mxu0  ;;  %v1420_v0 = vpop.f32.mrf.mxu1  ;;  %v1408_v1 = vadd.f32 %v1407_v53, %v1395_v60 }
 0x152   :  { %v2986_v63 = vld [vmem:[%s3303_s6] ss:$0 sm:$0xff] }
 0x153   :  { %v1421_v4 = vadd.f32 %v1420_v0, %v1408_v1 }
 0x156   :  { %v1396_v2 = vpop.f32.mrf.mxu3 }
 0x159   :  { %v1459_v55 = vpop.f32.mrf.mxu0  ;;  %v1422_v7 = vpop.f32.mrf.mxu1 }
 0x15a   :  { %v1433_v5 = vpop.f32.mrf.mxu2 }
 0x15b   :  { %v1434_v6 = vadd.f32 %v1433_v5, %v1421_v4 }
 0x15d   :  { %v1568_v9 = vmax.f32 %v1434_v6, 0.0 }
 0x15e   :  { %v1446_v14 = vpop.f32.mrf.mxu3 }
 0x15f   :  { %v1572_v10 = vpack.c.bf16 %v1568_v9, %v1568_v9  ;;  %v1447_v25 = vadd.f32 %v1446_v14, %v501_v23 }
 0x161   :  { %1856 = vmatmul.bf16.vlgmr.msra.gmra.mxu2 %v1572_v10  ;;  %v1461_v16 = vpop.f32.mrf.mxu0  ;;  %v1460_v26 = vadd.f32 %v1459_v55, %v1447_v25 }
 0x162   :  { %v1435_v15 = vpop.f32.mrf.mxu2 }
 0x166   :  { %v1448_v20 = vpop.f32.mrf.mxu3 }
 0x171   :  { %v1472_v24 = vpop.f32.mrf.mxu1 }
 0x172   :  { %v1473_v29 = vadd.f32 %v1472_v24, %v1460_v26 }
 0x179   :  { %v1511_v11 = vpop.f32.mrf.mxu0  ;;  %v1474_v28 = vpop.f32.mrf.mxu1 }
 0x17a   :  { %v1485_v47 = vpop.f32.mrf.mxu2  ;;  %v1512_v42 = vadd.f32 %v1511_v11, %v502_v40 }
 0x17b   :  { %v1486_v31 = vadd.f32 %v1485_v47, %v1473_v29 }
 0x17e   :  { %v1498_v32 = vpop.f32.mrf.mxu3 }
 0x17f   :  { %v1499_v33 = vadd.f32 %v1498_v32, %v1486_v31 }
 0x181   :  { %v1569_v13 = vmax.f32 %v1499_v33, 0.0  ;;  %v1513_v36 = vpop.f32.mrf.mxu0 }
 0x182   :  { %v1487_v35 = vpop.f32.mrf.mxu2 }
 0x183   :  { %v1573_v37 = vpack.c.bf16 %v1569_v13, %v1569_v13 }
 0x185   :  { %1869 = vmatmul.bf16.vlgmr.msra.gmra.mxu3 %v1573_v37 }
 0x186   :  { %v1500_v38 = vpop.f32.mrf.mxu3 }
 0x191   :  { %v1524_v39 = vpop.f32.mrf.mxu1 }
 0x192   :  { %v1525_v46 = vadd.f32 %v1524_v39, %v1512_v42 }
 0x199   :  { %v1537_v43 = vpop.f32.mrf.mxu2  ;;  %v1563_v44 = vpop.f32.mrf.mxu0 }
 0x19a   :  { %v1526_v45 = vpop.f32.mrf.mxu1  ;;  %v1538_v48 = vadd.f32 %v1537_v43, %v1525_v46 }
 0x19e   :  { %v1550_v49 = vpop.f32.mrf.mxu3 }
 0x19f   :  { %v1551_v50 = vadd.f32 %v1550_v49, %v1538_v48 }
 0x1a1   :  { %v1564_v51 = vadd.f32 %v1563_v44, %v1551_v50  ;;  %v1539_v52 = vpop.f32.mrf.mxu2  ;;  %v1565_v53 = vpop.f32.mrf.mxu0 }
 0x1a3   :  { %v1570_v54 = vmax.f32 %v1564_v51, 0.0 }
 0x1a5   :  { %v1574_v56 = vpack.c.bf16 %v1570_v54, %v1570_v54 }
 0x1a6   :  { %v1552_v57 = vpop.f32.mrf.mxu3 }
 0x1a7   :  { %1882 = vmatmul.bf16.vlgmr.msrb.gmra.mxu0 %v1574_v56 }
 0x1c6   :  { %v1844_v58 = vpop.f32.mrf.mxu1 }
 0x1c7   :  { %v1845_v0 = vadd.f32 %v2986_v63, %v1844_v58 }
 0x1ce   :  { %v1846_v59 = vpop.f32.mrf.mxu1 }
 0x1e4   :  { %v1857_v60 = vpop.f32.mrf.mxu2 }
 0x1e5   :  { %v1858_v1 = vadd.f32 %v1857_v60, %v1845_v0 }
 0x1ec   :  { %v1859_v61 = vpop.f32.mrf.mxu2 }
 0x208   :  { %v1870_v27 = vpop.f32.mrf.mxu3 }
 0x209   :  { %v1871_v2 = vadd.f32 %v1870_v27, %v1858_v1 }
 0x210   :  { %v1872_v62 = vpop.f32.mrf.mxu3 }
 0x224   :  { %v1883_v3 = vpop.f32.mrf.mxu0 }
 0x225   :  { %v1884_v4 = vadd.f32 %v1883_v3, %v1871_v2 }
 0x227   :  { %1887 = vst [vmem:[#allocation13] sm:$0xff] %v1884_v4 }
 0x228   :  { %1898 = dma.vmem_to_hbm [thread:$0]  %s1894_s11, 128, %s1896_s14, [#allocation4]  }
 0x22c   :  { %v1885_v5 = vpop.f32.mrf.mxu0 }
 0x22d   :  { %3163 = dma.done.wait [#allocation4], 128  }
 0x22e   :  { %3164 = vsyncadd [#allocation4], 4294967168 }
 0x22f   :  { %1903 = vsyncpa [#allocation3], 1 }
 0x230   :  { %1904 = vsyncpa [#allocation6], 1 }
 0x231   :  { %1905 = vsyncpa [#allocation9], 1 }
 0x232   :  { %1906 = vsyncpa [#allocation12], 1 }
 0x233   :  { %1907 = vsyncpa [#allocation4], 1 }

</bundles_post_ra>
